<compile_context>
chip_gen: v7x
topology: tpu7x:2x2x1
jax: 0.10.0
libtpu: 0.0.40
codegen_flags: <defaults>
</compile_context>

<pallas_src>
from typing import NamedTuple

import jax
import jax.numpy as jnp
from jax.experimental import pallas as pl
from jax.experimental.pallas import tpu as pltpu


def _round_up(v, m):
    return (v + m - 1) // m * m


# --------------------------------------------------------------------------
# Kernel 1: fc1 (x @ W1 + b1, ReLU).  Grid = (H1 tiles [parallel], K tiles).
# x is VMEM-resident; W1/b1 streamed tile-by-tile (auto double-buffered).
# --------------------------------------------------------------------------
def fc1_kernel(x_ref, w1_ref, b1_ref, h1_ref, acc_ref):
    k = pl.program_id(1)

    @pl.when(k == 0)
    def _():
        acc_ref[...] = jnp.zeros_like(acc_ref)

    tk = w1_ref.shape[0]
    start = pl.multiple_of(k * tk, tk)            # aligned slice of resident x
    acc_ref[...] += jnp.dot(x_ref[:, pl.ds(start, tk)], w1_ref[...],
                            preferred_element_type=jnp.float32)

    @pl.when(k == pl.num_programs(1) - 1)
    def _():
        # bias + ReLU; Dropout(p=0.2) is identity in eval mode.
        h1_ref[...] = jnp.maximum(acc_ref[...] + b1_ref[...], 0.0).astype(h1_ref.dtype)


# --------------------------------------------------------------------------
# Kernel 2: fc2 (+bias+ReLU) + fc3 (+bias) + sigmoid.
# Grid = (H1 tiles,) reduction; W2 streamed along its rows, W3/b2/b3 resident.
# --------------------------------------------------------------------------
def fc23_kernel(h1_ref, w2_ref, b2_ref, w3_ref, b3_ref, o_ref, acc_ref):
    k = pl.program_id(0)

    @pl.when(k == 0)
    def _():
        acc_ref[...] = jnp.zeros_like(acc_ref)

    acc_ref[...] += jnp.dot(h1_ref[...], w2_ref[...],
                            preferred_element_type=jnp.float32)

    @pl.when(k == pl.num_programs(0) - 1)
    def _():
        h2 = jnp.maximum(acc_ref[...] + b2_ref[...], 0.0)   # ReLU; dropout = identity
        h3 = jnp.dot(h2.astype(w3_ref.dtype), w3_ref[...],
                     preferred_element_type=jnp.float32) + b3_ref[...]
        # Stable sigmoid: sigmoid(x) == 0.5 * (tanh(x/2) + 1)  (tanh -> EUP slot)
        o_ref[...] = (0.5 * (jnp.tanh(0.5 * h3) + 1.0)).astype(o_ref.dtype)


# --------------------------------------------------------------------------
# One-time parameter preparation (pad + bf16 cast) — hoisted out of forward.
# --------------------------------------------------------------------------
class Prepared(NamedTuple):
    w1: jax.Array   # (d_in_p, h1_p)  bf16
    b1: jax.Array   # (1, h1_p)       f32
    w2: jax.Array   # (h1_p, h2_p)    bf16
    b2: jax.Array   # (1, h2_p)       f32
    w3: jax.Array   # (h2_p, d_out_p) bf16
    b3: jax.Array   # (1, d_out_p)    f32
    d_in: int
    d_out: int
    tk: int         # fc1 reduction tile
    tn1: int        # fc1 / fc2-reduction output tile


def prepare_params(params, *, tk=512, tn1=1024):
    """Pad to TPU-friendly sizes and cast to bf16 ONCE (not per forward call)."""
    w1, b1, w2, b2, w3, b3 = params
    d_in, h1 = w1.shape
    h2 = w2.shape[1]
    d_out = w3.shape[1]

    f32, bf16 = jnp.float32, jnp.bfloat16

    tk = min(tk, _round_up(d_in, 128))
    tn1 = min(tn1, _round_up(h1, 128))
    d_in_p = _round_up(d_in, tk)
    h1_p = _round_up(h1, tn1)
    h2_p = _round_up(h2, 128)
    d_out_p = _round_up(d_out, 128)     # lane-dense output stores

    # Zero padding is exact for this net: padded fc1/fc2 columns get bias 0 ->
    # relu(0)=0 and hit zero weight rows downstream.
    w1p = jnp.zeros((d_in_p, h1_p), bf16).at[:d_in, :h1].set(w1.astype(bf16))
    b1p = jnp.zeros((1, h1_p), f32).at[:, :h1].set(b1.astype(f32))
    w2p = jnp.zeros((h1_p, h2_p), bf16).at[:h1, :h2].set(w2.astype(bf16))
    b2p = jnp.zeros((1, h2_p), f32).at[:, :h2].set(b2.astype(f32))
    w3p = jnp.zeros((h2_p, d_out_p), bf16).at[:h2, :d_out].set(w3.astype(bf16))
    b3p = jnp.zeros((1, d_out_p), f32).at[:, :d_out].set(b3.astype(f32))

    return Prepared(w1p, b1p, w2p, b2p, w3p, b3p, d_in, d_out, tk, tn1)


def net_forward(x, p: Prepared):
    """x: (B, d_in) f32.  Returns (B, d_out) f32 = sigmoid(fc3(relu(fc2(relu(fc1(x))))))."""
    B, d_in = x.shape
    assert d_in == p.d_in
    d_in_p, h1_p = p.w1.shape
    h2_p = p.w2.shape[1]
    d_out_p = p.w3.shape[1]
    tk, tn1 = p.tk, p.tn1
    bp = _round_up(B, 8)

    f32, bf16 = jnp.float32, jnp.bfloat16

    xp = jnp.zeros((bp, d_in_p), bf16).at[:B, :d_in].set(x.astype(bf16))

    # ---------------- stage 1: fc1 (the HBM-bandwidth-dominant W1 stream) ----
    h1 = pl.pallas_call(
        fc1_kernel,
        out_shape=jax.ShapeDtypeStruct((bp, h1_p), bf16),
        grid_spec=pltpu.PrefetchScalarGridSpec(
            num_scalar_prefetch=0,
            grid=(h1_p // tn1, d_in_p // tk),          # (N blocks, K blocks), K innermost
            in_specs=[
                pl.BlockSpec((bp, d_in_p), lambda n, k: (0, 0)),   # x: VMEM-resident
                pl.BlockSpec((tk, tn1), lambda n, k: (k, n)),      # W1: streamed (K,N)
                pl.BlockSpec((1, tn1), lambda n, k: (0, n)),       # b1: streamed (N)
            ],
            out_specs=pl.BlockSpec((bp, tn1), lambda n, k: (0, n)),
            scratch_shapes=[pltpu.VMEM((bp, tn1), f32)],           # fc1 f32 accumulator
        ),
        compiler_params=pltpu.CompilerParams(
            # N axis is independent -> "parallel": shards the W1 stream across
            # both TensorCores on v7x; measured noise on single-TC v5e/v6e.
            dimension_semantics=("parallel", "arbitrary"),
            # Fits double-buffered 512x1024 bf16 W1 tiles + resident x on all
            # generations; stays under v7x's 64MiB physical VMEM.
            vmem_limit_bytes=48 * 1024 * 1024,
        ),
    )(xp, p.w1, p.b1)

    # ---------------- stage 2: fc2 + fc3 + sigmoid ----------------------------
    # NOTE: b2/W3/b3 are constant-index; pipeline_mode=pl.Buffered(1) could
    # reclaim their second buffer on tight-VMEM parts (minor, skipped for safety).
    out = pl.pallas_call(
        fc23_kernel,
        out_shape=jax.ShapeDtypeStruct((bp, d_out_p), f32),
        grid_spec=pltpu.PrefetchScalarGridSpec(
            num_scalar_prefetch=0,
            grid=(h1_p // tn1,),                                   # reduction over H1
            in_specs=[
                pl.BlockSpec((bp, tn1), lambda k: (0, k)),         # h1: streamed (K)
                pl.BlockSpec((tn1, h2_p), lambda k: (k, 0)),       # W2: streamed rows
                pl.BlockSpec((1, h2_p), lambda k: (0, 0)),         # b2: resident
                pl.BlockSpec((h2_p, d_out_p), lambda k: (0, 0)),   # W3: resident
                pl.BlockSpec((1, d_out_p), lambda k: (0, 0)),      # b3: resident
            ],
            out_specs=pl.BlockSpec((bp, d_out_p), lambda k: (0, 0)),
            scratch_shapes=[pltpu.VMEM((bp, h2_p), f32)],          # fc2 f32 accumulator
        ),
        compiler_params=pltpu.CompilerParams(
            dimension_semantics=("arbitrary",),
            vmem_limit_bytes=48 * 1024 * 1024,
        ),
    )(h1, p.w2, p.b2, p.w3, p.b3)

    return out[:B, :p.d_out]


def init_params(key, d_in, h1, h2, d_out):
    """Torch nn.Linear-style init: U(-1/sqrt(fan_in), 1/sqrt(fan_in)), (in,out) layout."""
    ks = jax.random.split(key, 6)

    def linear(kw, kb, fan_in, fan_out):
        bound = 1.0 / float(fan_in) ** 0.5
        w = jax.random.uniform(kw, (fan_in, fan_out), jnp.float32, -bound, bound)
        b = jax.random.uniform(kb, (1, fan_out), jnp.float32, -bound, bound)
        return w, b

    w1, b1 = linear(ks[0], ks[1], d_in, h1)
    w2, b2 = linear(ks[2], ks[3], h1, h2)
    w3, b3 = linear(ks[4], ks[5], h2, d_out)
    return (w1, b1, w2, b2, w3, b3)


if __name__ == "__main__":
    # Scaled-down shapes consistent with the module's structure
    # (original: 25860 -> 10000 -> 1000 -> 15; final output dim 15 preserved).
    # Chosen so both kernels exercise multi-block grids with the default tiles:
    #   fc1 grid = (2 N-blocks, 3 K-blocks), fc2/fc3 grid = (2 K-blocks).
    B, D_IN, H1, H2, D_OUT = 8, 1300, 1200, 200, 15

    key = jax.random.PRNGKey(0)
    kx, kp = jax.random.split(key)
    x = jax.random.normal(kx, (B, D_IN), jnp.float32)
    params = init_params(kp, D_IN, H1, H2, D_OUT)

    prepared = prepare_params(params)          # pad + bf16 cast ONCE (hoisted)
    out = jax.block_until_ready(net_forward(x, prepared))
    assert out.shape == (B, D_OUT)

    # Reference with the same bf16 quantization (pure JAX, outside Pallas).
    w1, b1, w2, b2, w3, b3 = params
    bf16 = jnp.bfloat16
    r1 = jnp.maximum(
        jnp.dot(x.astype(bf16), w1.astype(bf16),
                preferred_element_type=jnp.float32) + b1, 0.0)
    r2 = jnp.maximum(
        jnp.dot(r1.astype(bf16), w2.astype(bf16),
                preferred_element_type=jnp.float32) + b2, 0.0)
    ref = jax.nn.sigmoid(
        jnp.dot(r2.astype(bf16), w3.astype(bf16),
                preferred_element_type=jnp.float32) + b3)
    assert jnp.allclose(out, ref, atol=5e-3), float(jnp.max(jnp.abs(out - ref)))

    # Sanity vs full-f32 math (only bf16 quantization noise expected).
    ref_f32 = jax.nn.sigmoid(
        jnp.maximum(jnp.maximum(x @ w1 + b1, 0.0) @ w2 + b2, 0.0) @ w3 + b3)
    assert jnp.allclose(out, ref_f32, atol=3e-2), float(jnp.max(jnp.abs(out - ref_f32)))

    print("KERNEL_OK")
</pallas_src>

<mosaic_0001>
module attributes {stable_mosaic.version = 11 : i64} {
  func.func @fc1_kernel(%arg0: i32, %arg1: i32, %arg2: memref<8x1536xbf16, #tpu.memory_space<vmem>>, %arg3: memref<512x1024xbf16, #tpu.memory_space<vmem>>, %arg4: memref<1x1024xf32, #tpu.memory_space<vmem>>, %arg5: memref<8x1024xbf16, #tpu.memory_space<vmem>>, %arg6: memref<8x1024xf32, #tpu.memory_space<vmem>>) attributes {dimension_semantics = [#tpu.dimension_semantics<parallel>, #tpu.dimension_semantics<arbitrary>], iteration_bounds = array<i64: 2, 3>, scalar_prefetch = 0 : i64, scratch_operands = 1 : i64, tpu.core_type = #tpu.core_type<tc>, window_params = [{pipeline_mode = #tpu.pipeline_mode<synchronous>, transform_indices = @transform_0, window_bounds = array<i64: 8, 1536>}, {transform_indices = @transform_1, window_bounds = array<i64: 512, 1024>}, {transform_indices = @transform_2, window_bounds = array<i64: 1, 1024>}, {transform_indices = @transform_3, window_bounds = array<i64: 8, 1024>}]} {
    %c0_i32 = arith.constant 0 : i32
    %0 = arith.cmpi eq, %arg1, %c0_i32 : i32
    %1 = arith.extui %0 : i1 to i32
    %c0_i32_0 = arith.constant 0 : i32
    %2 = arith.cmpi ne, %1, %c0_i32_0 : i32
    scf.if %2 {
      %cst_8 = arith.constant 0.000000e+00 : f32
      %15 = vector.broadcast %cst_8 : f32 to vector<8x1024xf32>
      %c0_9 = arith.constant 0 : index
      %c0_10 = arith.constant 0 : index
      %16 = vector.load %arg6[%c0_9, %c0_10] : memref<8x1024xf32, #tpu.memory_space<vmem>>, vector<8x1024xf32>
      tpu.vector_store %arg6[%c0_9, %c0_10], %15 {strides = array<i32>} : memref<8x1024xf32, #tpu.memory_space<vmem>>, vector<8x1024xf32>,
    } else {
    }
    %c512_i32 = arith.constant 512 : i32
    %3 = arith.muli %arg1, %c512_i32 : i32
    %4 = tpu.assume_multiple %3, 512 : i32
    %c0 = arith.constant 0 : index
    %c0_1 = arith.constant 0 : index
    %5 = vector.load %arg6[%c0, %c0_1] : memref<8x1024xf32, #tpu.memory_space<vmem>>, vector<8x1024xf32>
    %c0_2 = arith.constant 0 : index
    %6 = arith.index_cast %4 : i32 to index
    %7 = vector.load %arg2[%c0_2, %6] : memref<8x1536xbf16, #tpu.memory_space<vmem>>, vector<8x512xbf16>
    %c0_3 = arith.constant 0 : index
    %c0_4 = arith.constant 0 : index
    %8 = vector.load %arg3[%c0_3, %c0_4] : memref<512x1024xbf16, #tpu.memory_space<vmem>>, vector<512x1024xbf16>
    %cst = arith.constant dense<0.000000e+00> : vector<8x1024xf32>
    %9 = tpu.matmul %7, %8, %cst {dimension_numbers = #tpu.dot_dimension_numbers<[1], [0], [0], [1], [0, 0, 1, 1], [], []>} : vector<8x512xbf16>, vector<512x1024xbf16>, vector<8x1024xf32> -> vector<8x1024xf32>
    %10 = arith.addf %5, %9 : vector<8x1024xf32>
    %c0_5 = arith.constant 0 : index
    %c0_6 = arith.constant 0 : index
    %11 = vector.load %arg6[%c0_5, %c0_6] : memref<8x1024xf32, #tpu.memory_space<vmem>>, vector<8x1024xf32>
    tpu.vector_store %arg6[%c0_5, %c0_6], %10 {strides = array<i32>} : memref<8x1024xf32, #tpu.memory_space<vmem>>, vector<8x1024xf32>,
    %c2_i32 = arith.constant 2 : i32
    %12 = arith.cmpi eq, %arg1, %c2_i32 : i32
    %13 = arith.extui %12 : i1 to i32
    %c0_i32_7 = arith.constant 0 : i32
    %14 = arith.cmpi ne, %13, %c0_i32_7 : i32
    scf.if %14 {
      %c0_8 = arith.constant 0 : index
      %c0_9 = arith.constant 0 : index
      %15 = vector.load %arg6[%c0_8, %c0_9] : memref<8x1024xf32, #tpu.memory_space<vmem>>, vector<8x1024xf32>
      %c0_10 = arith.constant 0 : index
      %c0_11 = arith.constant 0 : index
      %16 = vector.load %arg4[%c0_10, %c0_11] : memref<1x1024xf32, #tpu.memory_space<vmem>>, vector<1x1024xf32>
      %17 = vector.broadcast %16 : vector<1x1024xf32> to vector<8x1024xf32>
      %18 = arith.addf %15, %17 : vector<8x1024xf32>
      %cst_12 = arith.constant 0.000000e+00 : f32
      %19 = vector.broadcast %cst_12 : f32 to vector<8x1024xf32>
      %20 = arith.maximumf %18, %19 : vector<8x1024xf32>
      %21 = arith.truncf %20 : vector<8x1024xf32> to vector<8x1024xbf16>
      %c0_13 = arith.constant 0 : index
      %c0_14 = arith.constant 0 : index
      %22 = vector.load %arg5[%c0_13, %c0_14] : memref<8x1024xbf16, #tpu.memory_space<vmem>>, vector<8x1024xbf16>
      tpu.vector_store %arg5[%c0_13, %c0_14], %21 {strides = array<i32>} : memref<8x1024xbf16, #tpu.memory_space<vmem>>, vector<8x1024xbf16>,
    } else {
    }
    return
  }
  func.func @transform_0(%arg0: i32, %arg1: i32) -> (i32, i32) {
    %c0_i32 = arith.constant 0 : i32
    %c0_i32_0 = arith.constant 0 : i32
    %c0_i32_1 = arith.constant 0 : i32
    return %c0_i32, %c0_i32_0 : i32, i32
  }
  func.func @transform_1(%arg0: i32, %arg1: i32) -> (i32, i32) {
    %c0_i32 = arith.constant 0 : i32
    return %arg1, %arg0 : i32, i32
  }
  func.func @transform_2(%arg0: i32, %arg1: i32) -> (i32, i32) {
    %c0_i32 = arith.constant 0 : i32
    %c0_i32_0 = arith.constant 0 : i32
    return %c0_i32, %arg0 : i32, i32
  }
  func.func @transform_3(%arg0: i32, %arg1: i32) -> (i32, i32) {
    %c0_i32 = arith.constant 0 : i32
    %c0_i32_0 = arith.constant 0 : i32
    return %c0_i32, %arg0 : i32, i32
  }
}

</mosaic_0001>

<bundles_post_ra>
// kernel: tpu_custom_call.1
= control target key start
LH: loop header
LB: loop body
LE: loop exit
PB: predicated region body
PF: predicated region fallthrough
CT: control target
= control target key end

     0   :  { %s3736_s0 = inlined_call_operand.hbm [shape: bf16[8,1536], index: 0, kind: input, shape index: {}]   ;;  %s3737_s1 = inlined_call_operand.hbm [shape: bf16[1536,2048], index: 1, kind: input, shape index: {}]   ;;  %s3738_s2 = inlined_call_operand.hbm [shape: f32[1,2048], index: 2, kind: input, shape index: {}]   ;;  %s3739_s3 = inlined_call_operand.hbm [shape: bf16[8,2048], index: 3, kind: output, shape index: {}]  }
   0x1   :  { %3750 = sst [smem:[#allocation17_spill]] %s3737_s1 }
   0x2   :  { %3751 = sst [smem:[#allocation18_spill]] %s3739_s3 }
   0x3   :  { %8 = vsyncpa [#allocation4], 0 }
   0x4   :  { %9 = vsyncpa [#allocation7], 0 }
   0x5   :  { %11 = vsyncpa [#allocation7 + $0x1], 0 }
   0x6   :  { %12 = vsyncpa [#allocation5], 0 }
   0x7   :  { %14 = vsyncpa [#allocation5 + $0x1], 0  ;;  %s3090_s12 = smov 0   ;;  %s3092_s13 = smov 0  }
   0x8   :  { %s3094_s14 = smov 0   ;;  %s3096_s15 = smov 0  }
   0x9   :  { %s3098_s16 = smov 0   ;;  %s3100_s17 = smov 0  }
   0xa   :  { %s3102_s18 = smov 0   ;;  %s3104_s19 = smov 0  }
   0xb   :  { %s3106_s20 = smov 0   ;;  %s3108_s21 = smov 0  }
   0xc   :  { %s3110_s22 = smov 0  }
   0xd LB: > { %3752 = sst [smem:[#allocation14_spill]] %s3052_s20  ;;  %s29_s23 = sadd.s32 1, %s3052_s20  ;;  %s3060_s22 = sphi %s3110_s22, %s20_s22   ;;  %s3056_s21 = sphi %s3108_s21, %s3787_s21   ;;  %s3052_s20 = sphi %s3106_s20, %s3778_s20   ;;  %s3048_s19 = sphi %s3104_s19, %s3786_s19   ;;  %s3044_s18 = sphi %s3102_s18, %s3777_s18   ;;  %s3040_s17 = sphi %s3100_s17, %s3785_s17   ;;  %s3036_s16 = sphi %s3098_s16, %s3784_s16   ;;  %s3032_s15 = sphi %s3096_s15, %s3783_s15   ;;  %s3028_s14 = sphi %s3094_s14, %s3782_s14   ;;  %s3024_s13 = sphi %s3092_s13, %s3781_s13   ;;  %s3020_s12 = sphi %s3090_s12, %s3780_s12  }
   0xe   : > { %s32_s24 = sadd.s32 1, %s3056_s21  ;;  %p30_p0 = scmp.ge.s32.totalorder %s29_s23, 3 }
   0xf   : > { %s62_s25 = sadd.s32 1, %s3040_s17  ;;  %p69_p1 = scmp.ne.s32.totalorder %s3040_s17, %s3036_s16 }
  0x10   : > { %p70_p2 = scmp.eq.s32.totalorder %s3060_s22, 0  ;;  %s3789_s23 = smov (%p30_p0, %s29_s23), 0 }
  0x11   : > { %3753 = sst [smem:[#allocation15_spill]] %s3789_s23  ;;  %s3791_s24 = smov (!%p30_p0, %s32_s24), %s3056_s21 }
  0x12   : > { %s57_s26 = ssub.s32 %s3052_s20, %s3789_s23  ;;  %p3158_p3 = por %p70_p2, %p69_p1 }
  0x13   : > { %p34_p4 = scmp.ge.s32.totalorder %s3791_s24, 2  ;;  %p3743_p5 = scmp.lt.s32.totalorder %s3060_s22, 6 }
  0x14   : > { %s162_s28 = sand.u32 1, %s3060_s22   ;;  %s164_s29 = sand.u32 1, %s3040_s17  }
  0x15   : > { %s3793_s24 = smov (%p34_p4, %s3791_s24), 0  ;;  %s2423_s4 = sshll.u32 %s164_s29, 11 }
  0x16   : > { %3755 = sst [smem:[#allocation16_spill]] %s3793_s24  ;;  %s3169_s30 = ssub.s32 %s3056_s21, %s3793_s24 }
  0x17   : > { %s59_s5 = sor.u32 %s3169_s30, %s57_s26  ;;  %s2425_s6 = sshll.u32 %s3056_s21, 3 }
  0x18   : > { %p60_p6 = scmp.eq.s32.totalorder %s59_s5, 0  ;;  %s2709_s7 = sshll.u32 %s3052_s20, 10 }
  0x19   : > { %s166_s8 = scalar_lea.vmem [#allocation6], %s2423_s4  ;;  %s173_s11 = sadd.s32 %s2709_s7, %s2425_s6 }
  0x1a   : > { %s176_s9 = sshll.u32 %s166_s8, 4  ;;  %s2427_s23 = sshll.u32 %s173_s11, 6  ;;  %s3177_s9 = int_to_ptr.vmem [resolvable:$true] %s176_s9 }
  0x1b   : > { %s3175_s10 = scalar_select %p60_p6, %s3040_s17, %s62_s25  }
  0x1c   : > { %p3183_p7 = pnand %p3743_p5, %p3158_p3  ;;  %s3757_s1 = sld [smem:[#allocation17_spill]] }
  0x1d   : > { %s3192_s25 = scalar_lea.sflag [#allocation7], %s162_s28 }
  0x1e   : > { %p2844_p9 = pneg %p3183_p7 }
  0x22   : > { %s3190_s26 = scalar_lea.hbm %s3757_s1, %s2427_s23  ;;  %s2847_s5 = scalar_lea.hbm %s3757_s1, 196608 }
  0x23   : > { %s2842_s4 = scalar_lea.hbm %s3190_s26, 32768  ;;  %p2848_p12 = scmp.lt.u32.totalorder %s3190_s26, %s3757_s1 }
  0x24   : > { %p2843_p8 = scmp.ne.s32.totalorder %s3190_s26, %s2842_s4  ;;  %p2849_p13 = scmp.lt.u32.totalorder %s2847_s5, %s2842_s4 }
  0x25   : > { %p2851_p1 = scmp.lt.u32.totalorder %s2842_s4, %s3190_s26 }
  0x26   : > { %p2845_p10 = pnand %p2844_p9, %p2843_p8  ;;  %p2850_p0 = por %p2849_p13, %p2848_p12 }
  0x28   : > { %p2846_p11 = pneg %p2845_p10  ;;  %p2852_p3 = por %p2851_p1, %p2850_p0 }
  0x2a   : > { %p2853_p4 = pnand %p2852_p3, %p2846_p11 }
  0x2c   : > { %2856 = shalt.err (!%p2853_p4)
}
  0x2d   : > { %s2857_s28 = scalar_lea.vmem %s3177_s9, 32768  ;;  %s3062_s7 = smov [#allocation6]  }
  0x2e   : > { %p2858_p6 = scmp.ne.s32.totalorder %s3177_s9, %s2857_s28  ;;  %s2862_s8 = sshll.u32 %s3062_s7, 4  ;;  %s2863_s8 = int_to_ptr.vmem [resolvable:$false] %s2862_s8 }
  0x2f   : > { %s2864_s11 = scalar_lea.vmem %s2863_s8, 65536  ;;  %p2865_p5 = scmp.lt.s32.totalorder %s3177_s9, %s2863_s8 }
  0x30   : > { %p2860_p8 = pnand %p2858_p6, %p2844_p9  ;;  %p2866_p12 = scmp.lt.s32.totalorder %s2864_s11, %s2857_s28 }
  0x32   : > { %p2861_p10 = pneg %p2860_p8  ;;  %p2867_p13 = por %p2866_p12, %p2865_p5 }
  0x34   : > { %p2868_p0 = pnand %p2867_p13, %p2861_p10 }
  0x36   : > { %2871 = shalt.err (!%p2868_p0)
}
  0x37   : > { %s3063_s29 = smov 1024   ;;  %s3064_s4 = smov 512  }
  0x38   : > { %s3065_s27 = smov 32   ;;  %s3221_s24 = sadd.s32 4294967295, %s3060_s22  }
  0x39   : > { %2733 = dma.hbm_to_vmem [thread:$0]  (!%p3183_p7), %s3190_s26, 32768, %s3177_s9, %s3192_s25, %s3063_s29, %s3064_s4, %s3065_s27  }
  0x3a   : > { %s2419_s5 = sadd.s32 4294967294, %s3060_s22   ;;  %p75_p5 = scmp.ne.s32.totalorder %s3036_s16, %s3032_s15 }
  0x3b   : > { %p3744_p9 = scmp.eq.s32.totalorder %s3221_s24, 0  ;;  %p101_p11 = scmp.ne.s32.totalorder %s3024_s13, %s3020_s12 }
  0x3c   : > { %p131_p3 = scmp.eq.s32.totalorder %s2419_s5, 5  ;;  %p2420_p8 = scmp.ge.s32.totalorder %s3060_s22, 1 }
  0x3d   : > { %p3232_p7 = por %p3744_p9, %p75_p5  ;;  %p3238_p4 = por %p101_p11, %p3744_p9 }
  0x3e   : > { %p3242_p6 = por %p131_p3, %p101_p11  ;;  %p138_p10 = scmp.lt.s32.totalorder %s3060_s22, 7 }
  0x3f   : > { %s3758_s3 = scalar_select %p3232_p7, 1, 0 }
  0x40   : > { %s3759_s15 = scalar_select %p3238_p4, 1, 0 }
  0x41   : > { %s3760_s9 = scalar_select %p3242_p6, 1, 0 }
  0x42   : > { %p3248_p12 = pnand %p2420_p8, %p138_p10  ;;  %s3066_s23 = smov [#allocation3]  }
  0x43   : > { %s151_s6 = sshll.u32 %s3066_s23, 4  ;;  %p86_p0 = scmp.eq.s32.totalorder %s3169_s30, 0  ;;  %s152_s6 = int_to_ptr.vmem [resolvable:$true] %s151_s6 }
  0x44   : > { %s3761_s26 = scalar_select %p3248_p12, 1, 0 }
  0x45   : > { %p2726_p13 = pneg %p3248_p12  ;;  %s88_s28 = sadd.s32 1, %s3028_s14 }
  0x46   : > { %p3746_p5 = scmp.ne.s32.totalorder %s3028_s14, %s3024_s13  ;;  %s188_s8 = sand.u32 1, %s3028_s14  }
  0x47   : > { %p3260_p11 = pnand %p2726_p13, %p3744_p9  ;;  %s2872_s30 = scalar_lea.hbm %s3736_s0, 768 }
  0x48   : > { %s3266_s11 = scalar_select %p86_p0, %s3028_s14, %s88_s28  }
  0x49   : > { %p3273_p3 = por %p3746_p5, %p70_p2  ;;  %p2873_p8 = scmp.ne.s32.totalorder %s3736_s0, %s2872_s30 }
  0x4a   : > { %p2874_p10 = pneg %p3260_p11  ;;  %p2879_p0 = scmp.lt.u32.totalorder %s2872_s30, %s3736_s0 }
  0x4b   : > { %s3763_s29 = scalar_select %p3273_p3, 1, 0 }
  0x4c   : > { %p2875_p13 = pnand %p2874_p10, %p2873_p8 }
  0x4e   : > { %p2876_p9 = pneg %p2875_p13 }
  0x50   : > { %p2881_p2 = pnand %p2879_p0, %p2876_p9 }
  0x52   : > { %2884 = shalt.err (!%p2881_p2)
}
  0x53   : > { %s2885_s20 = scalar_lea.vmem %s152_s6, 768  ;;  %p2893_p4 = scmp.lt.s32.totalorder %s152_s6, %s152_s6 }
  0x54   : > { %p2886_p1 = scmp.ne.s32.totalorder %s152_s6, %s2885_s20  ;;  %p2894_p7 = scmp.lt.s32.totalorder %s2885_s20, %s2885_s20 }
  0x56   : > { %p2888_p5 = pnand %p2886_p1, %p2874_p10  ;;  %p2895_p12 = por %p2894_p7, %p2893_p4 }
  0x58   : > { %p2889_p6 = pneg %p2888_p5 }
  0x5a   : > { %p2896_p3 = pnand %p2895_p12, %p2889_p6 }
  0x5c   : > { %2899 = shalt.err (!%p2896_p3)
}
  0x5d   : > { %2729 = dma.hbm_to_vmem [thread:$0]  (!%p3260_p11), %s3736_s0, 768, %s152_s6, [#allocation4]  }
  0x5e   : > { %p3764_p9 = scmp.ne.s32.totalorder %s3028_s14, %s3024_s13  ;;  %p3765_p1 = scmp.eq.s32.totalorder %s3221_s24, 5 }
  0x5f   : > { %s2428_s20 = sshll.u32 %s188_s8, 3  ;;  %s2710_s30 = sshll.u32 %s3056_s21, 7 }
  0x60   : > { %p3298_p5 = por %p3765_p1, %p3764_p9  ;;  %s3306_s23 = scalar_lea.hbm %s3738_s2, %s2710_s30 }
  0x61   : > { %s190_s28 = scalar_lea.vmem [#allocation8], %s2428_s20  ;;  %p3767_p7 = scmp.ne.s32.totalorder %s3763_s29, 0 }
  0x62   : > { %s198_s4 = sshll.u32 %s190_s28, 4  ;;  %p3768_p4 = scmp.lt.s32.totalorder %s3060_s22, 6  ;;  %s3308_s4 = int_to_ptr.vmem [resolvable:$true] %s198_s4 }
  0x63   : > { %s2900_s8 = scalar_lea.hbm %s3306_s23, 128  ;;  %s2905_s30 = scalar_lea.hbm %s3738_s2, 256 }
  0x64   : > { %p3314_p6 = pnand %p3768_p4, %p3767_p7  ;;  %p2901_p12 = scmp.ne.s32.totalorder %s3306_s23, %s2900_s8 }
  0x65   : > { %p2906_p10 = scmp.lt.u32.totalorder %s3306_s23, %s3738_s2  ;;  %p2907_p13 = scmp.lt.u32.totalorder %s2905_s30, %s2900_s8 }
  0x66   : > { %p2902_p11 = pneg %p3314_p6  ;;  %p2909_p2 = scmp.lt.u32.totalorder %s2900_s8, %s3306_s23 }
  0x67   : > { %p2908_p0 = por %p2907_p13, %p2906_p10 }
  0x68   : > { %p2903_p3 = pnand %p2902_p11, %p2901_p12 }
  0x69   : > { %p2910_p9 = por %p2909_p2, %p2908_p0 }
  0x6a   : > { %p2904_p8 = pneg %p2903_p3 }
  0x6c   : > { %p2911_p1 = pnand %p2910_p9, %p2904_p8 }
  0x6e   : > { %2914 = shalt.err (!%p2911_p1)
}
  0x6f   : > { %s2915_s7 = scalar_lea.vmem %s3308_s4, 128  ;;  %s3067_s28 = smov [#allocation8]  }
  0x70   : > { %p2916_p7 = scmp.ne.s32.totalorder %s3308_s4, %s2915_s7  ;;  %s2920_s27 = sshll.u32 %s3067_s28, 4  ;;  %s2921_s27 = int_to_ptr.vmem [resolvable:$false] %s2920_s27 }
  0x71   : > { %s2922_s20 = scalar_lea.vmem %s2921_s27, 256  ;;  %p2923_p3 = scmp.lt.s32.totalorder %s3308_s4, %s2921_s27 }
  0x72   : > { %p2918_p4 = pnand %p2916_p7, %p2902_p11  ;;  %p2924_p10 = scmp.lt.s32.totalorder %s2922_s20, %s2915_s7 }
  0x74   : > { %p2919_p12 = pneg %p2918_p4  ;;  %p2925_p13 = por %p2924_p10, %p2923_p3 }
  0x76   : > { %p2926_p0 = pnand %p2925_p13, %p2919_p12 }
  0x78   : > { %2929 = shalt.err (!%p2926_p0)
}
  0x79   : > { %2736 = dma.hbm_to_vmem [thread:$0]  (!%p3314_p6), %s3306_s23, 128, %s3308_s4, %s3192_s25  }
  0x7a   : > { %p3770_p8 = scmp.ne.s32.totalorder %s3761_s26, 0 }
  0x7b   : > { %p3771_p11 = scmp.eq.s32.totalorder (!%p3770_p8), %s3221_s24, 0 }
  0x7c   : > { %207 = sbr.rel (%p3770_p8) target bundleno = 668 (0x29c), region = 32 }
  0x83   : > { %3003 = dma.done.wait (%p3771_p11), [#allocation4], 768   ;;  %p3772_p2 = pmov %p3771_p11 }
  0x84   : > { %s213_s8 = sand.u32 1, %s3221_s24   ;;  %s215_s30 = sand.u32 1, %s3036_s16  }
  0x85   : > { %3005 = vsyncadd (%p3772_p2), [#allocation4], 4294966528  ;;  %s2433_s29 = sshll.u32 %s215_s30, 11  ;;  %s214_s6 = scalar_lea.sflag [#allocation7], %s213_s8 }
  0x86   : > { %s3352_s5 = scalar_lea.vmem [#allocation6], %s2433_s29  ;;  %p3773_p9 = scmp.ne.s32.totalorder %s3758_s3, 0 }
  0x88   : > { %3007 = dma.done.wait (%p3773_p9), %s214_s6, 32768  }
  0x89   : > { %3009 = vsyncadd (%p3773_p9), %s214_s6, 4294934528  ;;  %s3359_s25 = sand.u32 1, %s3024_s13   ;;  %p3774_p6 = scmp.ne.s32.totalorder %s3759_s15, 0 }
  0x8a   : > { %s2434_s26 = sshll.u32 %s3359_s25, 3 }
  0x8b   : > { %s3362_s23 = scalar_lea.vmem [#allocation8], %s2434_s26 }
  0x8c   : > { %3011 = dma.done.wait (%p3774_p6), %s214_s6, 128  }
  0x8d   : > { %3013 = vsyncadd (%p3774_p6), %s214_s6, 4294967168  ;;  %s2435_s24 = sshll.u32 %s3359_s25, 5  ;;  %p2436_p1 = scmp.ne.s32.totalorder %s3044_s18, 0 }
  0x8e   : > { %s3369_s4 = scalar_lea.vmem [#allocation9], %s2435_s24  ;;  %v3068_v0 = vmov (!%p2436_p1), 0.0  }
  0x8f   : > { %261 = sbr.rel (%p2436_p1) target bundleno = 150 (0x96), region = 48  ;;  %262 = vst [vmem:[#allocation2] sm:$0xff] (!%p2436_p1), %v3068_v0  ;;  %263 = vst [vmem:[#allocation2 + $0x8] sm:$0xff] (!%p2436_p1), %v3068_v0 }
  0x90   : > { %264 = vst [vmem:[#allocation2 + $0x10] sm:$0xff] (!%p2436_p1), %v3068_v0  ;;  %265 = vst [vmem:[#allocation2 + $0x18] sm:$0xff] (!%p2436_p1), %v3068_v0 }
  0x91   : > { %266 = vst [vmem:[#allocation2 + $0x20] sm:$0xff] (!%p2436_p1), %v3068_v0  ;;  %267 = vst [vmem:[#allocation2 + $0x28] sm:$0xff] (!%p2436_p1), %v3068_v0 }
  0x92   : > { %268 = vst [vmem:[#allocation2 + $0x30] sm:$0xff] (!%p2436_p1), %v3068_v0  ;;  %269 = vst [vmem:[#allocation2 + $0x38] sm:$0xff] (!%p2436_p1), %v3068_v0 }
  0x96 PF: > { %v285_v1 = vld [vmem:[%s3352_s5] sm:$0xff]  ;;  %s2437_s3 = sshll.u32 %s3044_s18, 9  ;;  %p2699_p7 = scmp.ne.s32.totalorder %s3044_s18, 2 }
  0x97   : > { %v289_v2 = vld [vmem:[%s3352_s5 + $0x20] sm:$0xff]  ;;  %s3393_s15 = sshra.s32 %s2437_s3, 7 }
  0x98   : > { %v413_v3 = vld [vmem:[%s3352_s5 + $0x400] sm:$0xff]  ;;  %v2444_v4 = vcombine.high %v285_v1, %v289_v2  ;;  %v2443_v6 = vcombine.low %v285_v1, %v289_v2  ;;  %s2438_s7 = sshll.u32 %s3393_s15, 2 }
  0x99   : > { %v417_v5 = vld [vmem:[%s3352_s5 + $0x420] sm:$0xff]  ;;  %s282_s28 = scalar_lea.vmem [#allocation3], %s2438_s7 }
  0x9a   : > { %v293_v7 = vld [vmem:[%s3352_s5 + $0x40] sm:$0xff]  ;;  %v2572_v9 = vcombine.high %v413_v3, %v417_v5  ;;  %v2571_v10 = vcombine.low %v413_v3, %v417_v5  ;;  %1835 = vmatprep.subr.bf16.mxu0 %v2444_v4  ;;  %v3404_v54 = vld [vmem:[%s282_s28] sm:$0xff]  ;;  %v3406_v55 = vld [vmem:[%s282_s28 + $0x8] sm:$0xff] }
  0x9b   : > { %v297_v8 = vld [vmem:[%s3352_s5 + $0x60] sm:$0xff]  ;;  %1836 = vmatpush1.bf16.msra.mxu0 %v2443_v6  ;;  %v3412_v59 = vcombine.high %v3404_v54, %v3404_v54  ;;  %v3416_v60 = vcombine.high %v3406_v55, %v3406_v55 }
  0x9c   : > { %v2452_v11 = vcombine.high %v293_v7, %v297_v8  ;;  %v421_v12 = vld [vmem:[%s3352_s5 + $0x440] sm:$0xff]  ;;  %1876 = vmatprep.subr.bf16.mxu1 %v2572_v9  ;;  %v2451_v19 = vcombine.low %v293_v7, %v297_v8 }
  0x9d   : > { %v425_v13 = vld [vmem:[%s3352_s5 + $0x460] sm:$0xff]  ;;  %1877 = vmatpush1.bf16.msra.mxu1 %v2571_v10  ;;  %1867 = vmatprep.mubr.bf16.mxu0 %v3412_v59 }
  0x9e   : > { %v301_v14 = vld [vmem:[%s3352_s5 + $0x80] sm:$0xff]  ;;  %v2580_v15 = vcombine.high %v421_v12, %v425_v13  ;;  %1837 = vmatprep.subr.bf16.mxu0 %v2452_v11  ;;  %v2579_v20 = vcombine.low %v421_v12, %v425_v13  ;;  %1908 = vmatprep.mubr.bf16.mxu1 %v3416_v60 }
  0x9f   : > { %v305_v16 = vld [vmem:[%s3352_s5 + $0xa0] sm:$0xff]  ;;  %1838 = vmatpush1.bf16.msra.mxu0 %v2451_v19 }
  0xa0   : > { %v429_v17 = vld [vmem:[%s3352_s5 + $0x480] sm:$0xff]  ;;  %v2460_v21 = vcombine.high %v301_v14, %v305_v16  ;;  %1878 = vmatprep.subr.bf16.mxu1 %v2580_v15  ;;  %v2459_v27 = vcombine.low %v301_v14, %v305_v16 }
  0xa1   : > { %v433_v18 = vld [vmem:[%s3352_s5 + $0x4a0] sm:$0xff]  ;;  %1879 = vmatpush1.bf16.msra.mxu1 %v2579_v20 }
  0xa2   : > { %v2588_v22 = vcombine.high %v429_v17, %v433_v18  ;;  %v309_v23 = vld [vmem:[%s3352_s5 + $0xc0] sm:$0xff]  ;;  %1839 = vmatprep.subr.bf16.mxu0 %v2460_v21  ;;  %v2587_v28 = vcombine.low %v429_v17, %v433_v18 }
  0xa3   : > { %v313_v24 = vld [vmem:[%s3352_s5 + $0xe0] sm:$0xff]  ;;  %1840 = vmatpush1.bf16.msra.mxu0 %v2459_v27 }
  0xa4   : > { %v437_v25 = vld [vmem:[%s3352_s5 + $0x4c0] sm:$0xff]  ;;  %v2468_v29 = vcombine.high %v309_v23, %v313_v24  ;;  %1880 = vmatprep.subr.bf16.mxu1 %v2588_v22  ;;  %v2467_v35 = vcombine.low %v309_v23, %v313_v24 }
  0xa5   : > { %v441_v26 = vld [vmem:[%s3352_s5 + $0x4e0] sm:$0xff]  ;;  %1881 = vmatpush1.bf16.msra.mxu1 %v2587_v28 }
  0xa6   : > { %v2596_v30 = vcombine.high %v437_v25, %v441_v26  ;;  %v317_v31 = vld [vmem:[%s3352_s5 + $0x100] sm:$0xff]  ;;  %1841 = vmatprep.subr.bf16.mxu0 %v2468_v29  ;;  %v2595_v36 = vcombine.low %v437_v25, %v441_v26 }
  0xa7   : > { %v321_v32 = vld [vmem:[%s3352_s5 + $0x120] sm:$0xff]  ;;  %1842 = vmatpush1.bf16.msra.mxu0 %v2467_v35 }
  0xa8   : > { %v445_v33 = vld [vmem:[%s3352_s5 + $0x500] sm:$0xff]  ;;  %v2476_v37 = vcombine.high %v317_v31, %v321_v32  ;;  %1882 = vmatprep.subr.bf16.mxu1 %v2596_v30  ;;  %v2475_v43 = vcombine.low %v317_v31, %v321_v32 }
  0xa9   : > { %v449_v34 = vld [vmem:[%s3352_s5 + $0x520] sm:$0xff]  ;;  %1883 = vmatpush1.bf16.msra.mxu1 %v2595_v36 }
  0xaa   : > { %v2604_v38 = vcombine.high %v445_v33, %v449_v34  ;;  %v325_v39 = vld [vmem:[%s3352_s5 + $0x140] sm:$0xff]  ;;  %1843 = vmatprep.subr.bf16.mxu0 %v2476_v37  ;;  %v2603_v44 = vcombine.low %v445_v33, %v449_v34 }
  0xab   : > { %v329_v40 = vld [vmem:[%s3352_s5 + $0x160] sm:$0xff]  ;;  %1844 = vmatpush1.bf16.msra.mxu0 %v2475_v43 }
  0xac   : > { %v453_v41 = vld [vmem:[%s3352_s5 + $0x540] sm:$0xff]  ;;  %v2484_v45 = vcombine.high %v325_v39, %v329_v40  ;;  %1884 = vmatprep.subr.bf16.mxu1 %v2604_v38  ;;  %v2483_v51 = vcombine.low %v325_v39, %v329_v40 }
  0xad   : > { %v457_v42 = vld [vmem:[%s3352_s5 + $0x560] sm:$0xff]  ;;  %1885 = vmatpush1.bf16.msra.mxu1 %v2603_v44 }
  0xae   : > { %v2612_v46 = vcombine.high %v453_v41, %v457_v42  ;;  %v333_v47 = vld [vmem:[%s3352_s5 + $0x180] sm:$0xff]  ;;  %1845 = vmatprep.subr.bf16.mxu0 %v2484_v45  ;;  %v2611_v52 = vcombine.low %v453_v41, %v457_v42 }
  0xaf   : > { %v337_v48 = vld [vmem:[%s3352_s5 + $0x1a0] sm:$0xff]  ;;  %1846 = vmatpush1.bf16.msra.mxu0 %v2483_v51 }
  0xb0   : > { %v461_v49 = vld [vmem:[%s3352_s5 + $0x580] sm:$0xff]  ;;  %v2492_v53 = vcombine.high %v333_v47, %v337_v48  ;;  %1886 = vmatprep.subr.bf16.mxu1 %v2612_v46  ;;  %v2491_v63 = vcombine.low %v333_v47, %v337_v48 }
  0xb1   : > { %v465_v50 = vld [vmem:[%s3352_s5 + $0x5a0] sm:$0xff]  ;;  %1887 = vmatpush1.bf16.msra.mxu1 %v2611_v52 }
  0xb2   : > { %v2620_v56 = vcombine.high %v461_v49, %v465_v50  ;;  %v341_v57 = vld [vmem:[%s3352_s5 + $0x1c0] sm:$0xff]  ;;  %1847 = vmatprep.subr.bf16.mxu0 %v2492_v53  ;;  %v2619_v0 = vcombine.low %v461_v49, %v465_v50 }
  0xb3   : > { %v345_v58 = vld [vmem:[%s3352_s5 + $0x1e0] sm:$0xff]  ;;  %1848 = vmatpush1.bf16.msra.mxu0 %v2491_v63 }
  0xb4   : > { %v469_v61 = vld [vmem:[%s3352_s5 + $0x5c0] sm:$0xff]  ;;  %v2500_v1 = vcombine.high %v341_v57, %v345_v58  ;;  %1888 = vmatprep.subr.bf16.mxu1 %v2620_v56  ;;  %v2499_v7 = vcombine.low %v341_v57, %v345_v58 }
  0xb5   : > { %v473_v62 = vld [vmem:[%s3352_s5 + $0x5e0] sm:$0xff]  ;;  %1889 = vmatpush1.bf16.msra.mxu1 %v2619_v0 }
  0xb6   : > { %v2628_v2 = vcombine.high %v469_v61, %v473_v62  ;;  %v349_v3 = vld [vmem:[%s3352_s5 + $0x200] sm:$0xff]  ;;  %1849 = vmatprep.subr.bf16.mxu0 %v2500_v1  ;;  %v2627_v8 = vcombine.low %v469_v61, %v473_v62 }
  0xb7   : > { %v353_v4 = vld [vmem:[%s3352_s5 + $0x220] sm:$0xff]  ;;  %1850 = vmatpush1.bf16.msra.mxu0 %v2499_v7  ;;  %v286_v7 = vld [vmem:[%s3352_s5 + $0x8] sm:$0xff] }
  0xb8   : > { %v477_v5 = vld [vmem:[%s3352_s5 + $0x600] sm:$0xff]  ;;  %v2508_v9 = vcombine.high %v349_v3, %v353_v4  ;;  %1890 = vmatprep.subr.bf16.mxu1 %v2628_v2  ;;  %v2507_v15 = vcombine.low %v349_v3, %v353_v4 }
  0xb9   : > { %v481_v6 = vld [vmem:[%s3352_s5 + $0x620] sm:$0xff]  ;;  %1891 = vmatpush1.bf16.msra.mxu1 %v2627_v8  ;;  %v290_v8 = vld [vmem:[%s3352_s5 + $0x28] sm:$0xff] }
  0xba   : > { %v2636_v10 = vcombine.high %v477_v5, %v481_v6  ;;  %v357_v11 = vld [vmem:[%s3352_s5 + $0x240] sm:$0xff]  ;;  %1851 = vmatprep.subr.bf16.mxu0 %v2508_v9  ;;  %v2635_v16 = vcombine.low %v477_v5, %v481_v6  ;;  %v414_v9 = vld [vmem:[%s3352_s5 + $0x408] sm:$0xff] }
  0xbb   : > { %v361_v12 = vld [vmem:[%s3352_s5 + $0x260] sm:$0xff]  ;;  %1852 = vmatpush1.bf16.msra.mxu0 %v2507_v15  ;;  %v294_v15 = vld [vmem:[%s3352_s5 + $0x48] sm:$0xff] }
  0xbc   : > { %v485_v13 = vld [vmem:[%s3352_s5 + $0x640] sm:$0xff]  ;;  %v2516_v17 = vcombine.high %v357_v11, %v361_v12  ;;  %1892 = vmatprep.subr.bf16.mxu1 %v2636_v10  ;;  %v2515_v23 = vcombine.low %v357_v11, %v361_v12  ;;  %v418_v10 = vld [vmem:[%s3352_s5 + $0x428] sm:$0xff] }
  0xbd   : > { %v489_v14 = vld [vmem:[%s3352_s5 + $0x660] sm:$0xff]  ;;  %1893 = vmatpush1.bf16.msra.mxu1 %v2635_v16  ;;  %v298_v16 = vld [vmem:[%s3352_s5 + $0x68] sm:$0xff] }
  0xbe   : > { %v2644_v18 = vcombine.high %v485_v13, %v489_v14  ;;  %v365_v19 = vld [vmem:[%s3352_s5 + $0x280] sm:$0xff]  ;;  %1853 = vmatprep.subr.bf16.mxu0 %v2516_v17  ;;  %v2643_v24 = vcombine.low %v485_v13, %v489_v14  ;;  %v2446_v13 = vcombine.high %v286_v7, %v290_v8  ;;  %v2574_v14 = vcombine.high %v414_v9, %v418_v10 }
  0xbf   : > { %v369_v20 = vld [vmem:[%s3352_s5 + $0x2a0] sm:$0xff]  ;;  %1854 = vmatpush1.bf16.msra.mxu0 %v2515_v23  ;;  %v3462_v17 = vcombine.low %v3404_v54, %v3404_v54  ;;  %v2454_v23 = vcombine.high %v294_v15, %v298_v16  ;;  %v306_v54 = vld [vmem:[%s3352_s5 + $0xa8] sm:$0xff] }
  0xc0   : > { %v493_v21 = vld [vmem:[%s3352_s5 + $0x680] sm:$0xff]  ;;  %v2524_v25 = vcombine.high %v365_v19, %v369_v20  ;;  %1894 = vmatprep.subr.bf16.mxu1 %v2644_v18  ;;  %v2523_v31 = vcombine.low %v365_v19, %v369_v20  ;;  %v422_v18 = vld [vmem:[%s3352_s5 + $0x448] sm:$0xff]  ;;  %v3468_v20 = vcombine.low %v3406_v55, %v3406_v55  ;;  %v2453_v55 = vcombine.low %v294_v15, %v298_v16 }
  0xc1   : > { %v497_v22 = vld [vmem:[%s3352_s5 + $0x6a0] sm:$0xff]  ;;  %1895 = vmatpush1.bf16.msra.mxu1 %v2643_v24  ;;  %v426_v19 = vld [vmem:[%s3352_s5 + $0x468] sm:$0xff] }
  0xc2   : > { %v2652_v26 = vcombine.high %v493_v21, %v497_v22  ;;  %v373_v27 = vld [vmem:[%s3352_s5 + $0x2c0] sm:$0xff]  ;;  %1855 = vmatprep.subr.bf16.mxu0 %v2524_v25  ;;  %v2651_v32 = vcombine.low %v493_v21, %v497_v22  ;;  %v2445_v21 = vcombine.low %v286_v7, %v290_v8  ;;  %v2573_v22 = vcombine.low %v414_v9, %v418_v10  ;;  %v302_v25 = vld [vmem:[%s3352_s5 + $0x88] sm:$0xff] }
  0xc3   : > { %v377_v28 = vld [vmem:[%s3352_s5 + $0x2e0] sm:$0xff]  ;;  %1856 = vmatpush1.bf16.msra.mxu0 %v2523_v31  ;;  %v2582_v24 = vcombine.high %v422_v18, %v426_v19  ;;  %v310_v31 = vld [vmem:[%s3352_s5 + $0xc8] sm:$0xff] }
  0xc4   : > { %v501_v29 = vld [vmem:[%s3352_s5 + $0x6c0] sm:$0xff]  ;;  %v2532_v33 = vcombine.high %v373_v27, %v377_v28  ;;  %1896 = vmatprep.subr.bf16.mxu1 %v2652_v26  ;;  %v2531_v39 = vcombine.low %v373_v27, %v377_v28  ;;  %v430_v26 = vld [vmem:[%s3352_s5 + $0x488] sm:$0xff]  ;;  %v2581_v28 = vcombine.low %v422_v18, %v426_v19 }
  0xc5   : > { %v505_v30 = vld [vmem:[%s3352_s5 + $0x6e0] sm:$0xff]  ;;  %1897 = vmatpush1.bf16.msra.mxu1 %v2651_v32  ;;  %v434_v27 = vld [vmem:[%s3352_s5 + $0x4a8] sm:$0xff] }
  0xc6   : > { %v2660_v34 = vcombine.high %v501_v29, %v505_v30  ;;  %v381_v35 = vld [vmem:[%s3352_s5 + $0x300] sm:$0xff]  ;;  %1857 = vmatprep.subr.bf16.mxu0 %v2532_v33  ;;  %v2659_v40 = vcombine.low %v501_v29, %v505_v30  ;;  %v2462_v29 = vcombine.high %v302_v25, %v306_v54  ;;  %v2590_v30 = vcombine.high %v430_v26, %v434_v27  ;;  %v314_v32 = vld [vmem:[%s3352_s5 + $0xe8] sm:$0xff] }
  0xc7   : > { %v385_v36 = vld [vmem:[%s3352_s5 + $0x320] sm:$0xff]  ;;  %1858 = vmatpush1.bf16.msra.mxu0 %v2531_v39  ;;  %v438_v33 = vld [vmem:[%s3352_s5 + $0x4c8] sm:$0xff] }
  0xc8   : > { %v509_v37 = vld [vmem:[%s3352_s5 + $0x700] sm:$0xff]  ;;  %v2540_v41 = vcombine.high %v381_v35, %v385_v36  ;;  %1898 = vmatprep.subr.bf16.mxu1 %v2660_v34  ;;  %v2539_v47 = vcombine.low %v381_v35, %v385_v36  ;;  %v442_v34 = vld [vmem:[%s3352_s5 + $0x4e8] sm:$0xff]  ;;  %v2461_v35 = vcombine.low %v302_v25, %v306_v54  ;;  %v2589_v36 = vcombine.low %v430_v26, %v434_v27 }
  0xc9   : > { %v513_v38 = vld [vmem:[%s3352_s5 + $0x720] sm:$0xff]  ;;  %1899 = vmatpush1.bf16.msra.mxu1 %v2659_v40  ;;  %v318_v39 = vld [vmem:[%s3352_s5 + $0x108] sm:$0xff] }
  0xca   : > { %v2668_v42 = vcombine.high %v509_v37, %v513_v38  ;;  %v389_v43 = vld [vmem:[%s3352_s5 + $0x340] sm:$0xff]  ;;  %1859 = vmatprep.subr.bf16.mxu0 %v2540_v41  ;;  %v2667_v48 = vcombine.low %v509_v37, %v513_v38  ;;  %v2470_v37 = vcombine.high %v310_v31, %v314_v32  ;;  %v2598_v38 = vcombine.high %v438_v33, %v442_v34  ;;  %v322_v40 = vld [vmem:[%s3352_s5 + $0x128] sm:$0xff] }
  0xcb   : > { %v393_v44 = vld [vmem:[%s3352_s5 + $0x360] sm:$0xff]  ;;  %1860 = vmatpush1.bf16.msra.mxu0 %v2539_v47  ;;  %v446_v41 = vld [vmem:[%s3352_s5 + $0x508] sm:$0xff] }
  0xcc   : > { %v517_v45 = vld [vmem:[%s3352_s5 + $0x740] sm:$0xff]  ;;  %v2548_v49 = vcombine.high %v389_v43, %v393_v44  ;;  %1900 = vmatprep.subr.bf16.mxu1 %v2668_v42  ;;  %v2547_v57 = vcombine.low %v389_v43, %v393_v44  ;;  %v450_v42 = vld [vmem:[%s3352_s5 + $0x528] sm:$0xff]  ;;  %v2469_v43 = vcombine.low %v310_v31, %v314_v32  ;;  %v2597_v44 = vcombine.low %v438_v33, %v442_v34 }
  0xcd   : > { %v521_v46 = vld [vmem:[%s3352_s5 + $0x760] sm:$0xff]  ;;  %1901 = vmatpush1.bf16.msra.mxu1 %v2667_v48  ;;  %v326_v47 = vld [vmem:[%s3352_s5 + $0x148] sm:$0xff] }
  0xce   : > { %v2676_v50 = vcombine.high %v517_v45, %v521_v46  ;;  %v397_v51 = vld [vmem:[%s3352_s5 + $0x380] sm:$0xff]  ;;  %1861 = vmatprep.subr.bf16.mxu0 %v2548_v49  ;;  %v2675_v58 = vcombine.low %v517_v45, %v521_v46  ;;  %v2478_v45 = vcombine.high %v318_v39, %v322_v40  ;;  %v2606_v46 = vcombine.high %v446_v41, %v450_v42  ;;  %v330_v48 = vld [vmem:[%s3352_s5 + $0x168] sm:$0xff] }
  0xcf   : > { %v401_v52 = vld [vmem:[%s3352_s5 + $0x3a0] sm:$0xff]  ;;  %1862 = vmatpush1.bf16.msra.mxu0 %v2547_v57  ;;  %v454_v49 = vld [vmem:[%s3352_s5 + $0x548] sm:$0xff] }
  0xd0   : > { %v525_v53 = vld [vmem:[%s3352_s5 + $0x780] sm:$0xff]  ;;  %v2556_v61 = vcombine.high %v397_v51, %v401_v52  ;;  %1902 = vmatprep.subr.bf16.mxu1 %v2676_v50  ;;  %v2555_v3 = vcombine.low %v397_v51, %v401_v52  ;;  %v458_v50 = vld [vmem:[%s3352_s5 + $0x568] sm:$0xff]  ;;  %v2477_v51 = vcombine.low %v318_v39, %v322_v40  ;;  %v2605_v52 = vcombine.low %v446_v41, %v450_v42 }
  0xd1   : > { %v529_v56 = vld [vmem:[%s3352_s5 + $0x7a0] sm:$0xff]  ;;  %1903 = vmatpush1.bf16.msra.mxu1 %v2675_v58  ;;  %v334_v57 = vld [vmem:[%s3352_s5 + $0x188] sm:$0xff] }
  0xd2   : > { %v2684_v62 = vcombine.high %v525_v53, %v529_v56  ;;  %v405_v63 = vld [vmem:[%s3352_s5 + $0x3c0] sm:$0xff]  ;;  %1863 = vmatprep.subr.bf16.mxu0 %v2556_v61  ;;  %v2683_v4 = vcombine.low %v525_v53, %v529_v56  ;;  %v2486_v53 = vcombine.high %v326_v47, %v330_v48  ;;  %v2614_v56 = vcombine.high %v454_v49, %v458_v50  ;;  %v338_v58 = vld [vmem:[%s3352_s5 + $0x1a8] sm:$0xff] }
  0xd3   : > { %v409_v0 = vld [vmem:[%s3352_s5 + $0x3e0] sm:$0xff]  ;;  %1864 = vmatpush1.bf16.msra.mxu0 %v2555_v3  ;;  %v462_v61 = vld [vmem:[%s3352_s5 + $0x588] sm:$0xff]  ;;  %v2493_v7 = vcombine.low %v334_v57, %v338_v58 }
  0xd4   : > { %v533_v1 = vld [vmem:[%s3352_s5 + $0x7c0] sm:$0xff]  ;;  %v2564_v5 = vcombine.high %v405_v63, %v409_v0  ;;  %1904 = vmatprep.subr.bf16.mxu1 %v2684_v62  ;;  %v2563_v11 = vcombine.low %v405_v63, %v409_v0  ;;  %v466_v62 = vld [vmem:[%s3352_s5 + $0x5a8] sm:$0xff]  ;;  %v2485_v63 = vcombine.low %v326_v47, %v330_v48  ;;  %v2613_v0 = vcombine.low %v454_v49, %v458_v50 }
  0xd5   : > { %v537_v2 = vld [vmem:[%s3352_s5 + $0x7e0] sm:$0xff]  ;;  %1905 = vmatpush1.bf16.msra.mxu1 %v2683_v4  ;;  %v342_v3 = vld [vmem:[%s3352_s5 + $0x1c8] sm:$0xff]  ;;  %v2621_v8 = vcombine.low %v462_v61, %v466_v62 }
  0xd6   : > { %v2692_v6 = vcombine.high %v533_v1, %v537_v2  ;;  %1865 = vmatprep.subr.bf16.mxu0 %v2564_v5  ;;  %v2691_v12 = vcombine.low %v533_v1, %v537_v2  ;;  %v2494_v1 = vcombine.high %v334_v57, %v338_v58  ;;  %v2622_v2 = vcombine.high %v462_v61, %v466_v62  ;;  %v346_v4 = vld [vmem:[%s3352_s5 + $0x1e8] sm:$0xff] }
  0xd7   : > { %1866 = vmatpush1.bf16.msra.mxu0 %v2563_v11  ;;  %v470_v5 = vld [vmem:[%s3352_s5 + $0x5c8] sm:$0xff]  ;;  %v2502_v9 = vcombine.high %v342_v3, %v346_v4  ;;  %v2501_v15 = vcombine.low %v342_v3, %v346_v4 }
  0xd8   : > { %1906 = vmatprep.subr.bf16.mxu1 %v2692_v6  ;;  %1917 = vmatprep.subr.bf16.mxu0 %v2446_v13  ;;  %v474_v6 = vld [vmem:[%s3352_s5 + $0x5e8] sm:$0xff] }
  0xd9   : > { %1907 = vmatpush1.bf16.msra.mxu1 %v2691_v12  ;;  %v2630_v10 = vcombine.high %v470_v5, %v474_v6  ;;  %v350_v11 = vld [vmem:[%s3352_s5 + $0x208] sm:$0xff]  ;;  %v2629_v16 = vcombine.low %v470_v5, %v474_v6 }
  0xda   : > { %1958 = vmatprep.subr.bf16.mxu1 %v2574_v14  ;;  %1868 = vmatmul.mubr.bf16.vlgmr.msra.gmra.mrb[0].mxu0 %v3462_v17  ;;  %v354_v12 = vld [vmem:[%s3352_s5 + $0x228] sm:$0xff] }
  0xdb   : > { %1918 = vmatpush1.bf16.msra.mxu0 %v2445_v21  ;;  %1949 = vmatprep.mubr.bf16.mxu0 %v3412_v59  ;;  %v478_v13 = vld [vmem:[%s3352_s5 + $0x608] sm:$0xff]  ;;  %v2510_v18 = vcombine.high %v350_v11, %v354_v12  ;;  %v2509_v25 = vcombine.low %v350_v11, %v354_v12 }
  0xdc   : > { %1909 = vmatmul.mubr.bf16.vlgmr.msra.gmra.mrb[0].mxu1 %v3468_v20  ;;  %1919 = vmatprep.subr.bf16.mxu0 %v2454_v23  ;;  %v482_v14 = vld [vmem:[%s3352_s5 + $0x628] sm:$0xff] }
  0xdd   : > { %1959 = vmatpush1.bf16.msra.mxu1 %v2573_v22  ;;  %1990 = vmatprep.mubr.bf16.mxu1 %v3416_v60  ;;  %v2638_v19 = vcombine.high %v478_v13, %v482_v14  ;;  %v358_v21 = vld [vmem:[%s3352_s5 + $0x248] sm:$0xff]  ;;  %v2637_v54 = vcombine.low %v478_v13, %v482_v14 }
  0xde   : > { %1960 = vmatprep.subr.bf16.mxu1 %v2582_v24  ;;  %v362_v22 = vld [vmem:[%s3352_s5 + $0x268] sm:$0xff] }
  0xdf   : > { %1920 = vmatpush1.bf16.msra.mxu0 %v2453_v55  ;;  %v486_v23 = vld [vmem:[%s3352_s5 + $0x648] sm:$0xff]  ;;  %v2518_v26 = vcombine.high %v358_v21, %v362_v22  ;;  %v2517_v31 = vcombine.low %v358_v21, %v362_v22 }
  0xe0   : > { %1921 = vmatprep.subr.bf16.mxu0 %v2462_v29  ;;  %v490_v24 = vld [vmem:[%s3352_s5 + $0x668] sm:$0xff] }
  0xe1   : > { %1961 = vmatpush1.bf16.msra.mxu1 %v2581_v28  ;;  %v2646_v27 = vcombine.high %v486_v23, %v490_v24  ;;  %v366_v55 = vld [vmem:[%s3352_s5 + $0x288] sm:$0xff]  ;;  %v2645_v32 = vcombine.low %v486_v23, %v490_v24 }
  0xe2   : > { %1962 = vmatprep.subr.bf16.mxu1 %v2590_v30  ;;  %v370_v28 = vld [vmem:[%s3352_s5 + $0x2a8] sm:$0xff] }
  0xe3   : > { %1922 = vmatpush1.bf16.msra.mxu0 %v2461_v35  ;;  %v494_v29 = vld [vmem:[%s3352_s5 + $0x688] sm:$0xff]  ;;  %v2526_v33 = vcombine.high %v366_v55, %v370_v28  ;;  %v2525_v39 = vcombine.low %v366_v55, %v370_v28 }
  0xe4   : > { %1923 = vmatprep.subr.bf16.mxu0 %v2470_v37  ;;  %v498_v30 = vld [vmem:[%s3352_s5 + $0x6a8] sm:$0xff] }
  0xe5   : > { %1963 = vmatpush1.bf16.msra.mxu1 %v2589_v36  ;;  %v2654_v34 = vcombine.high %v494_v29, %v498_v30  ;;  %v374_v35 = vld [vmem:[%s3352_s5 + $0x2c8] sm:$0xff]  ;;  %v2653_v40 = vcombine.low %v494_v29, %v498_v30 }
  0xe6   : > { %1964 = vmatprep.subr.bf16.mxu1 %v2598_v38  ;;  %v378_v36 = vld [vmem:[%s3352_s5 + $0x2e8] sm:$0xff] }
  0xe7   : > { %1924 = vmatpush1.bf16.msra.mxu0 %v2469_v43  ;;  %v502_v37 = vld [vmem:[%s3352_s5 + $0x6c8] sm:$0xff]  ;;  %v2534_v41 = vcombine.high %v374_v35, %v378_v36  ;;  %v2533_v47 = vcombine.low %v374_v35, %v378_v36 }
  0xe8   : > { %1925 = vmatprep.subr.bf16.mxu0 %v2478_v45  ;;  %v506_v38 = vld [vmem:[%s3352_s5 + $0x6e8] sm:$0xff] }
  0xe9   : > { %1965 = vmatpush1.bf16.msra.mxu1 %v2597_v44  ;;  %v2662_v42 = vcombine.high %v502_v37, %v506_v38  ;;  %v382_v43 = vld [vmem:[%s3352_s5 + $0x308] sm:$0xff]  ;;  %v2661_v48 = vcombine.low %v502_v37, %v506_v38 }
  0xea   : > { %1966 = vmatprep.subr.bf16.mxu1 %v2606_v46  ;;  %v386_v44 = vld [vmem:[%s3352_s5 + $0x328] sm:$0xff] }
  0xeb   : > { %1926 = vmatpush1.bf16.msra.mxu0 %v2477_v51  ;;  %v510_v45 = vld [vmem:[%s3352_s5 + $0x708] sm:$0xff]  ;;  %v2542_v49 = vcombine.high %v382_v43, %v386_v44  ;;  %v2541_v57 = vcombine.low %v382_v43, %v386_v44 }
  0xec   : > { %1927 = vmatprep.subr.bf16.mxu0 %v2486_v53  ;;  %v514_v46 = vld [vmem:[%s3352_s5 + $0x728] sm:$0xff] }
  0xed   : > { %1967 = vmatpush1.bf16.msra.mxu1 %v2605_v52  ;;  %v2670_v50 = vcombine.high %v510_v45, %v514_v46  ;;  %v390_v51 = vld [vmem:[%s3352_s5 + $0x348] sm:$0xff]  ;;  %v2669_v58 = vcombine.low %v510_v45, %v514_v46 }
  0xee   : > { %1968 = vmatprep.subr.bf16.mxu1 %v2614_v56  ;;  %v394_v52 = vld [vmem:[%s3352_s5 + $0x368] sm:$0xff] }
  0xef   : > { %1928 = vmatpush1.bf16.msra.mxu0 %v2485_v63  ;;  %v518_v53 = vld [vmem:[%s3352_s5 + $0x748] sm:$0xff]  ;;  %v2550_v61 = vcombine.high %v390_v51, %v394_v52  ;;  %v2549_v3 = vcombine.low %v390_v51, %v394_v52 }
  0xf0   : > { %1929 = vmatprep.subr.bf16.mxu0 %v2494_v1  ;;  %v522_v56 = vld [vmem:[%s3352_s5 + $0x768] sm:$0xff] }
  0xf1   : > { %1969 = vmatpush1.bf16.msra.mxu1 %v2613_v0  ;;  %v2678_v62 = vcombine.high %v518_v53, %v522_v56  ;;  %v398_v63 = vld [vmem:[%s3352_s5 + $0x388] sm:$0xff]  ;;  %v2677_v4 = vcombine.low %v518_v53, %v522_v56 }
  0xf2   : > { %1970 = vmatprep.subr.bf16.mxu1 %v2622_v2  ;;  %v402_v0 = vld [vmem:[%s3352_s5 + $0x3a8] sm:$0xff] }
  0xf3   : > { %1930 = vmatpush1.bf16.msra.mxu0 %v2493_v7  ;;  %v526_v1 = vld [vmem:[%s3352_s5 + $0x788] sm:$0xff]  ;;  %v2558_v5 = vcombine.high %v398_v63, %v402_v0  ;;  %v2557_v11 = vcombine.low %v398_v63, %v402_v0 }
  0xf4   : > { %1931 = vmatprep.subr.bf16.mxu0 %v2502_v9  ;;  %v530_v2 = vld [vmem:[%s3352_s5 + $0x7a8] sm:$0xff] }
  0xf5   : > { %1971 = vmatpush1.bf16.msra.mxu1 %v2621_v8  ;;  %v2686_v6 = vcombine.high %v526_v1, %v530_v2  ;;  %v406_v7 = vld [vmem:[%s3352_s5 + $0x3c8] sm:$0xff]  ;;  %v2685_v12 = vcombine.low %v526_v1, %v530_v2 }
  0xf6   : > { %1972 = vmatprep.subr.bf16.mxu1 %v2630_v10  ;;  %v410_v8 = vld [vmem:[%s3352_s5 + $0x3e8] sm:$0xff] }
  0xf7   : > { %1932 = vmatpush1.bf16.msra.mxu0 %v2501_v15  ;;  %v534_v9 = vld [vmem:[%s3352_s5 + $0x7c8] sm:$0xff]  ;;  %v2566_v13 = vcombine.high %v406_v7, %v410_v8  ;;  %v287_v15 = vld [vmem:[%s3352_s5 + $0x10] sm:$0xff]  ;;  %v2565_v21 = vcombine.low %v406_v7, %v410_v8 }
  0xf8   : > { %1933 = vmatprep.subr.bf16.mxu0 %v2510_v18  ;;  %v538_v10 = vld [vmem:[%s3352_s5 + $0x7e8] sm:$0xff]  ;;  %v415_v18 = vld [vmem:[%s3352_s5 + $0x410] sm:$0xff] }
  0xf9   : > { %1973 = vmatpush1.bf16.msra.mxu1 %v2629_v16  ;;  %v2694_v14 = vcombine.high %v534_v9, %v538_v10  ;;  %v291_v16 = vld [vmem:[%s3352_s5 + $0x30] sm:$0xff]  ;;  %v2693_v22 = vcombine.low %v534_v9, %v538_v10 }
  0xfa   : > { %1974 = vmatprep.subr.bf16.mxu1 %v2638_v19  ;;  %v419_v19 = vld [vmem:[%s3352_s5 + $0x430] sm:$0xff]  ;;  %v2448_v23 = vcombine.high %v287_v15, %v291_v16  ;;  %v2447_v55 = vcombine.low %v287_v15, %v291_v16 }
  0xfb   : > { %1934 = vmatpush1.bf16.msra.mxu0 %v2509_v25  ;;  %v2576_v24 = vcombine.high %v415_v18, %v419_v19  ;;  %v295_v25 = vld [vmem:[%s3352_s5 + $0x50] sm:$0xff]  ;;  %v2575_v28 = vcombine.low %v415_v18, %v419_v19 }
  0xfc   : > { %1935 = vmatprep.subr.bf16.mxu0 %v2518_v26  ;;  %v423_v26 = vld [vmem:[%s3352_s5 + $0x450] sm:$0xff] }
  0xfd   : > { %1975 = vmatpush1.bf16.msra.mxu1 %v2637_v54  ;;  %v299_v54 = vld [vmem:[%s3352_s5 + $0x70] sm:$0xff] }
  0xfe   : > { %1976 = vmatprep.subr.bf16.mxu1 %v2646_v27  ;;  %v427_v27 = vld [vmem:[%s3352_s5 + $0x470] sm:$0xff]  ;;  %v2456_v29 = vcombine.high %v295_v25, %v299_v54  ;;  %v2455_v35 = vcombine.low %v295_v25, %v299_v54 }
  0xff   : > { %1936 = vmatpush1.bf16.msra.mxu0 %v2517_v31  ;;  %v2584_v30 = vcombine.high %v423_v26, %v427_v27  ;;  %v303_v31 = vld [vmem:[%s3352_s5 + $0x90] sm:$0xff]  ;;  %v2583_v36 = vcombine.low %v423_v26, %v427_v27 }
 0x100   : > { %1937 = vmatprep.subr.bf16.mxu0 %v2526_v33  ;;  %v431_v33 = vld [vmem:[%s3352_s5 + $0x490] sm:$0xff] }
 0x101   : > { %1977 = vmatpush1.bf16.msra.mxu1 %v2645_v32  ;;  %v307_v32 = vld [vmem:[%s3352_s5 + $0xb0] sm:$0xff] }
 0x102   : > { %1978 = vmatprep.subr.bf16.mxu1 %v2654_v34  ;;  %v435_v34 = vld [vmem:[%s3352_s5 + $0x4b0] sm:$0xff]  ;;  %v2464_v37 = vcombine.high %v303_v31, %v307_v32  ;;  %v2463_v43 = vcombine.low %v303_v31, %v307_v32 }
 0x103   : > { %1938 = vmatpush1.bf16.msra.mxu0 %v2525_v39  ;;  %v2592_v38 = vcombine.high %v431_v33, %v435_v34  ;;  %v311_v39 = vld [vmem:[%s3352_s5 + $0xd0] sm:$0xff]  ;;  %v2591_v44 = vcombine.low %v431_v33, %v435_v34 }
 0x104   : > { %1939 = vmatprep.subr.bf16.mxu0 %v2534_v41  ;;  %v439_v41 = vld [vmem:[%s3352_s5 + $0x4d0] sm:$0xff] }
 0x105   : > { %1979 = vmatpush1.bf16.msra.mxu1 %v2653_v40  ;;  %v315_v40 = vld [vmem:[%s3352_s5 + $0xf0] sm:$0xff] }
 0x106   : > { %1980 = vmatprep.subr.bf16.mxu1 %v2662_v42  ;;  %v443_v42 = vld [vmem:[%s3352_s5 + $0x4f0] sm:$0xff]  ;;  %v2472_v45 = vcombine.high %v311_v39, %v315_v40  ;;  %v2471_v51 = vcombine.low %v311_v39, %v315_v40 }
 0x107   : > { %1940 = vmatpush1.bf16.msra.mxu0 %v2533_v47  ;;  %v2600_v46 = vcombine.high %v439_v41, %v443_v42  ;;  %v319_v47 = vld [vmem:[%s3352_s5 + $0x110] sm:$0xff]  ;;  %v2599_v52 = vcombine.low %v439_v41, %v443_v42 }
 0x108   : > { %1941 = vmatprep.subr.bf16.mxu0 %v2542_v49  ;;  %v447_v49 = vld [vmem:[%s3352_s5 + $0x510] sm:$0xff] }
 0x109   : > { %1981 = vmatpush1.bf16.msra.mxu1 %v2661_v48  ;;  %v323_v48 = vld [vmem:[%s3352_s5 + $0x130] sm:$0xff] }
 0x10a   : > { %1982 = vmatprep.subr.bf16.mxu1 %v2670_v50  ;;  %v451_v50 = vld [vmem:[%s3352_s5 + $0x530] sm:$0xff]  ;;  %v2480_v53 = vcombine.high %v319_v47, %v323_v48  ;;  %v2479_v63 = vcombine.low %v319_v47, %v323_v48 }
 0x10b   : > { %1942 = vmatpush1.bf16.msra.mxu0 %v2541_v57  ;;  %v2608_v56 = vcombine.high %v447_v49, %v451_v50  ;;  %v327_v57 = vld [vmem:[%s3352_s5 + $0x150] sm:$0xff]  ;;  %v2607_v0 = vcombine.low %v447_v49, %v451_v50 }
 0x10c   : > { %1943 = vmatprep.subr.bf16.mxu0 %v2550_v61  ;;  %v455_v61 = vld [vmem:[%s3352_s5 + $0x550] sm:$0xff] }
 0x10d   : > { %1983 = vmatpush1.bf16.msra.mxu1 %v2669_v58  ;;  %v331_v58 = vld [vmem:[%s3352_s5 + $0x170] sm:$0xff] }
 0x10e   : > { %1984 = vmatprep.subr.bf16.mxu1 %v2678_v62  ;;  %v459_v62 = vld [vmem:[%s3352_s5 + $0x570] sm:$0xff]  ;;  %v2488_v1 = vcombine.high %v327_v57, %v331_v58  ;;  %v2487_v7 = vcombine.low %v327_v57, %v331_v58 }
 0x10f   : > { %1944 = vmatpush1.bf16.msra.mxu0 %v2549_v3  ;;  %v2616_v2 = vcombine.high %v455_v61, %v459_v62  ;;  %v335_v3 = vld [vmem:[%s3352_s5 + $0x190] sm:$0xff]  ;;  %v2615_v8 = vcombine.low %v455_v61, %v459_v62 }
 0x110   : > { %1945 = vmatprep.subr.bf16.mxu0 %v2558_v5  ;;  %v463_v5 = vld [vmem:[%s3352_s5 + $0x590] sm:$0xff] }
 0x111   : > { %1985 = vmatpush1.bf16.msra.mxu1 %v2677_v4  ;;  %v339_v4 = vld [vmem:[%s3352_s5 + $0x1b0] sm:$0xff] }
 0x112   : > { %1986 = vmatprep.subr.bf16.mxu1 %v2686_v6  ;;  %v467_v6 = vld [vmem:[%s3352_s5 + $0x5b0] sm:$0xff]  ;;  %v2496_v9 = vcombine.high %v335_v3, %v339_v4  ;;  %v2495_v15 = vcombine.low %v335_v3, %v339_v4 }
 0x113   : > { %1946 = vmatpush1.bf16.msra.mxu0 %v2557_v11  ;;  %v2624_v10 = vcombine.high %v463_v5, %v467_v6  ;;  %v343_v11 = vld [vmem:[%s3352_s5 + $0x1d0] sm:$0xff]  ;;  %v2623_v16 = vcombine.low %v463_v5, %v467_v6 }
 0x114   : > { %1947 = vmatprep.subr.bf16.mxu0 %v2566_v13  ;;  %v471_v13 = vld [vmem:[%s3352_s5 + $0x5d0] sm:$0xff] }
 0x115   : > { %1987 = vmatpush1.bf16.msra.mxu1 %v2685_v12  ;;  %v347_v12 = vld [vmem:[%s3352_s5 + $0x1f0] sm:$0xff] }
 0x116   : > { %1988 = vmatprep.subr.bf16.mxu1 %v2694_v14  ;;  %v475_v14 = vld [vmem:[%s3352_s5 + $0x5f0] sm:$0xff]  ;;  %v2504_v18 = vcombine.high %v343_v11, %v347_v12  ;;  %v2503_v25 = vcombine.low %v343_v11, %v347_v12 }
 0x117   : > { %1948 = vmatpush1.bf16.msra.mxu0 %v2565_v21  ;;  %v2632_v19 = vcombine.high %v471_v13, %v475_v14  ;;  %v351_v21 = vld [vmem:[%s3352_s5 + $0x210] sm:$0xff]  ;;  %v2631_v54 = vcombine.low %v471_v13, %v475_v14 }
 0x118   : > { %1999 = vmatprep.subr.bf16.mxu0 %v2448_v23  ;;  %v479_v23 = vld [vmem:[%s3352_s5 + $0x610] sm:$0xff] }
 0x119   : > { %1989 = vmatpush1.bf16.msra.mxu1 %v2693_v22  ;;  %v355_v22 = vld [vmem:[%s3352_s5 + $0x230] sm:$0xff] }
 0x11a   : > { %2040 = vmatprep.subr.bf16.mxu1 %v2576_v24  ;;  %1950 = vmatmul.mubr.bf16.vlgmr.msra.gmra.mrb[4].mxu0 %v3462_v17  ;;  %v483_v24 = vld [vmem:[%s3352_s5 + $0x630] sm:$0xff]  ;;  %v2512_v26 = vcombine.high %v351_v21, %v355_v22  ;;  %v2511_v31 = vcombine.low %v351_v21, %v355_v22 }
 0x11b   : > { %2000 = vmatpush1.bf16.msra.mxu0 %v2447_v55  ;;  %2031 = vmatprep.mubr.bf16.mxu0 %v3412_v59  ;;  %v2640_v27 = vcombine.high %v479_v23, %v483_v24  ;;  %v359_v55 = vld [vmem:[%s3352_s5 + $0x250] sm:$0xff]  ;;  %v2639_v32 = vcombine.low %v479_v23, %v483_v24 }
 0x11c   : > { %1991 = vmatmul.mubr.bf16.vlgmr.msra.gmra.mrb[4].mxu1 %v3468_v20  ;;  %2001 = vmatprep.subr.bf16.mxu0 %v2456_v29  ;;  %v487_v29 = vld [vmem:[%s3352_s5 + $0x650] sm:$0xff] }
 0x11d   : > { %2041 = vmatpush1.bf16.msra.mxu1 %v2575_v28  ;;  %2072 = vmatprep.mubr.bf16.mxu1 %v3416_v60  ;;  %v363_v28 = vld [vmem:[%s3352_s5 + $0x270] sm:$0xff] }
 0x11e   : > { %2042 = vmatprep.subr.bf16.mxu1 %v2584_v30  ;;  %v491_v30 = vld [vmem:[%s3352_s5 + $0x670] sm:$0xff]  ;;  %v2520_v33 = vcombine.high %v359_v55, %v363_v28  ;;  %v2519_v39 = vcombine.low %v359_v55, %v363_v28 }
 0x11f   : > { %2002 = vmatpush1.bf16.msra.mxu0 %v2455_v35  ;;  %v2648_v34 = vcombine.high %v487_v29, %v491_v30  ;;  %v367_v35 = vld [vmem:[%s3352_s5 + $0x290] sm:$0xff]  ;;  %v2647_v40 = vcombine.low %v487_v29, %v491_v30 }
 0x120   : > { %2003 = vmatprep.subr.bf16.mxu0 %v2464_v37  ;;  %v495_v37 = vld [vmem:[%s3352_s5 + $0x690] sm:$0xff] }
 0x121   : > { %2043 = vmatpush1.bf16.msra.mxu1 %v2583_v36  ;;  %v371_v36 = vld [vmem:[%s3352_s5 + $0x2b0] sm:$0xff] }
 0x122   : > { %2044 = vmatprep.subr.bf16.mxu1 %v2592_v38  ;;  %v499_v38 = vld [vmem:[%s3352_s5 + $0x6b0] sm:$0xff]  ;;  %v2528_v41 = vcombine.high %v367_v35, %v371_v36  ;;  %v2527_v47 = vcombine.low %v367_v35, %v371_v36 }
 0x123   : > { %2004 = vmatpush1.bf16.msra.mxu0 %v2463_v43  ;;  %v2656_v42 = vcombine.high %v495_v37, %v499_v38  ;;  %v375_v43 = vld [vmem:[%s3352_s5 + $0x2d0] sm:$0xff]  ;;  %v2655_v48 = vcombine.low %v495_v37, %v499_v38 }
 0x124   : > { %2005 = vmatprep.subr.bf16.mxu0 %v2472_v45  ;;  %v503_v45 = vld [vmem:[%s3352_s5 + $0x6d0] sm:$0xff] }
 0x125   : > { %2045 = vmatpush1.bf16.msra.mxu1 %v2591_v44  ;;  %v379_v44 = vld [vmem:[%s3352_s5 + $0x2f0] sm:$0xff] }
 0x126   : > { %2046 = vmatprep.subr.bf16.mxu1 %v2600_v46  ;;  %v507_v46 = vld [vmem:[%s3352_s5 + $0x6f0] sm:$0xff]  ;;  %v2536_v49 = vcombine.high %v375_v43, %v379_v44  ;;  %v2535_v57 = vcombine.low %v375_v43, %v379_v44 }
 0x127   : > { %2006 = vmatpush1.bf16.msra.mxu0 %v2471_v51  ;;  %v2664_v50 = vcombine.high %v503_v45, %v507_v46  ;;  %v383_v51 = vld [vmem:[%s3352_s5 + $0x310] sm:$0xff]  ;;  %v2663_v58 = vcombine.low %v503_v45, %v507_v46 }
 0x128   : > { %2007 = vmatprep.subr.bf16.mxu0 %v2480_v53  ;;  %v511_v53 = vld [vmem:[%s3352_s5 + $0x710] sm:$0xff] }
 0x129   : > { %2047 = vmatpush1.bf16.msra.mxu1 %v2599_v52  ;;  %v387_v52 = vld [vmem:[%s3352_s5 + $0x330] sm:$0xff] }
 0x12a   : > { %2048 = vmatprep.subr.bf16.mxu1 %v2608_v56  ;;  %v515_v56 = vld [vmem:[%s3352_s5 + $0x730] sm:$0xff]  ;;  %v2544_v61 = vcombine.high %v383_v51, %v387_v52  ;;  %v2543_v3 = vcombine.low %v383_v51, %v387_v52 }
 0x12b   : > { %2008 = vmatpush1.bf16.msra.mxu0 %v2479_v63  ;;  %v2672_v62 = vcombine.high %v511_v53, %v515_v56  ;;  %v391_v63 = vld [vmem:[%s3352_s5 + $0x350] sm:$0xff]  ;;  %v2671_v4 = vcombine.low %v511_v53, %v515_v56 }
 0x12c   : > { %2009 = vmatprep.subr.bf16.mxu0 %v2488_v1  ;;  %v519_v1 = vld [vmem:[%s3352_s5 + $0x750] sm:$0xff] }
 0x12d   : > { %2049 = vmatpush1.bf16.msra.mxu1 %v2607_v0  ;;  %v395_v0 = vld [vmem:[%s3352_s5 + $0x370] sm:$0xff] }
 0x12e   : > { %2050 = vmatprep.subr.bf16.mxu1 %v2616_v2  ;;  %v523_v2 = vld [vmem:[%s3352_s5 + $0x770] sm:$0xff]  ;;  %v2552_v5 = vcombine.high %v391_v63, %v395_v0  ;;  %v2551_v11 = vcombine.low %v391_v63, %v395_v0 }
 0x12f   : > { %2010 = vmatpush1.bf16.msra.mxu0 %v2487_v7  ;;  %v2680_v6 = vcombine.high %v519_v1, %v523_v2  ;;  %v399_v7 = vld [vmem:[%s3352_s5 + $0x390] sm:$0xff]  ;;  %v2679_v12 = vcombine.low %v519_v1, %v523_v2  ;;  %v328_v1 = vld [vmem:[%s3352_s5 + $0x158] sm:$0xff] }
 0x130   : > { %2011 = vmatprep.subr.bf16.mxu0 %v2496_v9  ;;  %v527_v9 = vld [vmem:[%s3352_s5 + $0x790] sm:$0xff]  ;;  %v332_v2 = vld [vmem:[%s3352_s5 + $0x178] sm:$0xff] }
 0x131   : > { %2051 = vmatpush1.bf16.msra.mxu1 %v2615_v8  ;;  %v403_v8 = vld [vmem:[%s3352_s5 + $0x3b0] sm:$0xff] }
 0x132   : > { %2052 = vmatprep.subr.bf16.mxu1 %v2624_v10  ;;  %v531_v10 = vld [vmem:[%s3352_s5 + $0x7b0] sm:$0xff]  ;;  %v2560_v13 = vcombine.high %v399_v7, %v403_v8  ;;  %v2559_v21 = vcombine.low %v399_v7, %v403_v8  ;;  %v2490_v7 = vcombine.high %v328_v1, %v332_v2 }
 0x133   : > { %2012 = vmatpush1.bf16.msra.mxu0 %v2495_v15  ;;  %v2688_v14 = vcombine.high %v527_v9, %v531_v10  ;;  %v407_v15 = vld [vmem:[%s3352_s5 + $0x3d0] sm:$0xff]  ;;  %v2687_v22 = vcombine.low %v527_v9, %v531_v10  ;;  %v336_v9 = vld [vmem:[%s3352_s5 + $0x198] sm:$0xff] }
 0x134   : > { %2013 = vmatprep.subr.bf16.mxu0 %v2504_v18  ;;  %v535_v18 = vld [vmem:[%s3352_s5 + $0x7d0] sm:$0xff]  ;;  %v340_v10 = vld [vmem:[%s3352_s5 + $0x1b8] sm:$0xff] }
 0x135   : > { %2053 = vmatpush1.bf16.msra.mxu1 %v2623_v16  ;;  %v411_v16 = vld [vmem:[%s3352_s5 + $0x3f0] sm:$0xff] }
 0x136   : > { %2054 = vmatprep.subr.bf16.mxu1 %v2632_v19  ;;  %v539_v19 = vld [vmem:[%s3352_s5 + $0x7f0] sm:$0xff]  ;;  %v2568_v23 = vcombine.high %v407_v15, %v411_v16  ;;  %v2567_v55 = vcombine.low %v407_v15, %v411_v16  ;;  %v2498_v15 = vcombine.high %v336_v9, %v340_v10 }
 0x137   : > { %2014 = vmatpush1.bf16.msra.mxu0 %v2503_v25  ;;  %v2696_v24 = vcombine.high %v535_v18, %v539_v19  ;;  %v288_v25 = vld [vmem:[%s3352_s5 + $0x18] sm:$0xff]  ;;  %v2695_v28 = vcombine.low %v535_v18, %v539_v19 }
 0x138   : > { %2015 = vmatprep.subr.bf16.mxu0 %v2512_v26  ;;  %v416_v26 = vld [vmem:[%s3352_s5 + $0x418] sm:$0xff] }
 0x139   : > { %2055 = vmatpush1.bf16.msra.mxu1 %v2631_v54  ;;  %v292_v54 = vld [vmem:[%s3352_s5 + $0x38] sm:$0xff] }
 0x13a   : > { %2056 = vmatprep.subr.bf16.mxu1 %v2640_v27  ;;  %v420_v27 = vld [vmem:[%s3352_s5 + $0x438] sm:$0xff]  ;;  %v2450_v29 = vcombine.high %v288_v25, %v292_v54  ;;  %v2449_v35 = vcombine.low %v288_v25, %v292_v54 }
 0x13b   : > { %2016 = vmatpush1.bf16.msra.mxu0 %v2511_v31  ;;  %v2578_v30 = vcombine.high %v416_v26, %v420_v27  ;;  %v296_v31 = vld [vmem:[%s3352_s5 + $0x58] sm:$0xff]  ;;  %v2577_v36 = vcombine.low %v416_v26, %v420_v27 }
 0x13c   : > { %2017 = vmatprep.subr.bf16.mxu0 %v2520_v33  ;;  %v424_v33 = vld [vmem:[%s3352_s5 + $0x458] sm:$0xff] }
 0x13d   : > { %2057 = vmatpush1.bf16.msra.mxu1 %v2639_v32  ;;  %v300_v32 = vld [vmem:[%s3352_s5 + $0x78] sm:$0xff] }
 0x13e   : > { %2058 = vmatprep.subr.bf16.mxu1 %v2648_v34  ;;  %v428_v34 = vld [vmem:[%s3352_s5 + $0x478] sm:$0xff]  ;;  %v2458_v37 = vcombine.high %v296_v31, %v300_v32  ;;  %v2457_v43 = vcombine.low %v296_v31, %v300_v32 }
 0x13f   : > { %2018 = vmatpush1.bf16.msra.mxu0 %v2519_v39  ;;  %v2586_v38 = vcombine.high %v424_v33, %v428_v34  ;;  %v304_v39 = vld [vmem:[%s3352_s5 + $0x98] sm:$0xff]  ;;  %v2585_v44 = vcombine.low %v424_v33, %v428_v34 }
 0x140   : > { %2019 = vmatprep.subr.bf16.mxu0 %v2528_v41  ;;  %v432_v41 = vld [vmem:[%s3352_s5 + $0x498] sm:$0xff] }
 0x141   : > { %2059 = vmatpush1.bf16.msra.mxu1 %v2647_v40  ;;  %v308_v40 = vld [vmem:[%s3352_s5 + $0xb8] sm:$0xff] }
 0x142   : > { %2060 = vmatprep.subr.bf16.mxu1 %v2656_v42  ;;  %v436_v42 = vld [vmem:[%s3352_s5 + $0x4b8] sm:$0xff]  ;;  %v2466_v45 = vcombine.high %v304_v39, %v308_v40  ;;  %v2465_v51 = vcombine.low %v304_v39, %v308_v40 }
 0x143   : > { %2020 = vmatpush1.bf16.msra.mxu0 %v2527_v47  ;;  %v2594_v46 = vcombine.high %v432_v41, %v436_v42  ;;  %v312_v47 = vld [vmem:[%s3352_s5 + $0xd8] sm:$0xff]  ;;  %v2593_v52 = vcombine.low %v432_v41, %v436_v42 }
 0x144   : > { %2021 = vmatprep.subr.bf16.mxu0 %v2536_v49  ;;  %v440_v49 = vld [vmem:[%s3352_s5 + $0x4d8] sm:$0xff] }
 0x145   : > { %2061 = vmatpush1.bf16.msra.mxu1 %v2655_v48  ;;  %v316_v48 = vld [vmem:[%s3352_s5 + $0xf8] sm:$0xff] }
 0x146   : > { %2062 = vmatprep.subr.bf16.mxu1 %v2664_v50  ;;  %v444_v50 = vld [vmem:[%s3352_s5 + $0x4f8] sm:$0xff]  ;;  %v2474_v53 = vcombine.high %v312_v47, %v316_v48 }
 0x147   : > { %2022 = vmatpush1.bf16.msra.mxu0 %v2535_v57  ;;  %v2602_v56 = vcombine.high %v440_v49, %v444_v50  ;;  %v320_v57 = vld [vmem:[%s3352_s5 + $0x118] sm:$0xff] }
 0x148   : > { %2023 = vmatprep.subr.bf16.mxu0 %v2544_v61  ;;  %v448_v61 = vld [vmem:[%s3352_s5 + $0x518] sm:$0xff] }
 0x149   : > { %2063 = vmatpush1.bf16.msra.mxu1 %v2663_v58  ;;  %v324_v58 = vld [vmem:[%s3352_s5 + $0x138] sm:$0xff] }
 0x14a   : > { %2064 = vmatprep.subr.bf16.mxu1 %v2672_v62  ;;  %v2473_v62 = vcombine.low %v312_v47, %v316_v48  ;;  %v2482_v63 = vcombine.high %v320_v57, %v324_v58  ;;  %v344_v18 = vld [vmem:[%s3352_s5 + $0x1d8] sm:$0xff] }
 0x14b   : > { %2024 = vmatpush1.bf16.msra.mxu0 %v2543_v3  ;;  %v456_v3 = vld [vmem:[%s3352_s5 + $0x558] sm:$0xff] }
 0x14c   : > { %2025 = vmatprep.subr.bf16.mxu0 %v2552_v5  ;;  %v2481_v5 = vcombine.low %v320_v57, %v324_v58  ;;  %v348_v19 = vld [vmem:[%s3352_s5 + $0x1f8] sm:$0xff] }
 0x14d   : > { %2065 = vmatpush1.bf16.msra.mxu1 %v2671_v4  ;;  %v460_v4 = vld [vmem:[%s3352_s5 + $0x578] sm:$0xff]  ;;  %v2506_v25 = vcombine.high %v344_v18, %v348_v19 }
 0x14e   : > { %2066 = vmatprep.subr.bf16.mxu1 %v2680_v6  ;;  %v2618_v8 = vcombine.high %v456_v3, %v460_v4  ;;  %v352_v26 = vld [vmem:[%s3352_s5 + $0x218] sm:$0xff] }
 0x14f   : > { %2026 = vmatpush1.bf16.msra.mxu0 %v2551_v11  ;;  %v464_v11 = vld [vmem:[%s3352_s5 + $0x598] sm:$0xff] }
 0x150   : > { %2027 = vmatprep.subr.bf16.mxu0 %v2560_v13  ;;  %v2489_v13 = vcombine.low %v328_v1, %v332_v2  ;;  %v356_v27 = vld [vmem:[%s3352_s5 + $0x238] sm:$0xff] }
 0x151   : > { %2067 = vmatpush1.bf16.msra.mxu1 %v2679_v12  ;;  %v468_v12 = vld [vmem:[%s3352_s5 + $0x5b8] sm:$0xff]  ;;  %v2514_v31 = vcombine.high %v352_v26, %v356_v27 }
 0x152   : > { %2068 = vmatprep.subr.bf16.mxu1 %v2688_v14  ;;  %v2617_v14 = vcombine.low %v456_v3, %v460_v4  ;;  %v2626_v16 = vcombine.high %v464_v11, %v468_v12  ;;  %v360_v33 = vld [vmem:[%s3352_s5 + $0x258] sm:$0xff] }
 0x153   : > { %2028 = vmatpush1.bf16.msra.mxu0 %v2559_v21  ;;  %v472_v21 = vld [vmem:[%s3352_s5 + $0x5d8] sm:$0xff] }
 0x154   : > { %2029 = vmatprep.subr.bf16.mxu0 %v2568_v23  ;;  %v2497_v23 = vcombine.low %v336_v9, %v340_v10  ;;  %v364_v34 = vld [vmem:[%s3352_s5 + $0x278] sm:$0xff] }
 0x155   : > { %2069 = vmatpush1.bf16.msra.mxu1 %v2687_v22  ;;  %v476_v22 = vld [vmem:[%s3352_s5 + $0x5f8] sm:$0xff]  ;;  %v2522_v39 = vcombine.high %v360_v33, %v364_v34 }
 0x156   : > { %2070 = vmatprep.subr.bf16.mxu1 %v2696_v24  ;;  %v2625_v24 = vcombine.low %v464_v11, %v468_v12  ;;  %v2634_v54 = vcombine.high %v472_v21, %v476_v22  ;;  %v368_v41 = vld [vmem:[%s3352_s5 + $0x298] sm:$0xff] }
 0x157   : > { %2030 = vmatpush1.bf16.msra.mxu0 %v2567_v55  ;;  %v480_v55 = vld [vmem:[%s3352_s5 + $0x618] sm:$0xff] }
 0x158   : > { %2081 = vmatprep.subr.bf16.mxu0 %v2450_v29  ;;  %v2505_v29 = vcombine.low %v344_v18, %v348_v19  ;;  %v372_v42 = vld [vmem:[%s3352_s5 + $0x2b8] sm:$0xff] }
 0x159   : > { %2071 = vmatpush1.bf16.msra.mxu1 %v2695_v28  ;;  %v484_v28 = vld [vmem:[%s3352_s5 + $0x638] sm:$0xff]  ;;  %v2530_v47 = vcombine.high %v368_v41, %v372_v42 }
 0x15a   : > { %2122 = vmatprep.subr.bf16.mxu1 %v2578_v30  ;;  %2032 = vmatmul.mubr.bf16.vlgmr.msra.gmra.mrb[8].mxu0 %v3462_v17  ;;  %v2633_v30 = vcombine.low %v472_v21, %v476_v22  ;;  %v2642_v32 = vcombine.high %v480_v55, %v484_v28  ;;  %v392_v3 = vld [vmem:[%s3352_s5 + $0x358] sm:$0xff] }
 0x15b   : > { %2082 = vmatpush1.bf16.msra.mxu0 %v2449_v35  ;;  %2113 = vmatprep.mubr.bf16.mxu0 %v3412_v59  ;;  %v452_v59 = vld [vmem:[%s3352_s5 + $0x538] sm:$0xff] }
 0x15c   : > { %2073 = vmatmul.mubr.bf16.vlgmr.msra.gmra.mrb[8].mxu1 %v3468_v20  ;;  %2083 = vmatprep.subr.bf16.mxu0 %v2458_v37  ;;  %v2610_v0 = vcombine.high %v448_v61, %v452_v59  ;;  %v2609_v6 = vcombine.low %v448_v61, %v452_v59  ;;  %v488_v35 = vld [vmem:[%s3352_s5 + $0x658] sm:$0xff]  ;;  %v2513_v37 = vcombine.low %v352_v26, %v356_v27 }
 0x15d   : > { %2123 = vmatpush1.bf16.msra.mxu1 %v2577_v36  ;;  %2154 = vmatprep.mubr.bf16.mxu1 %v3416_v60  ;;  %v2601_v60 = vcombine.low %v440_v49, %v444_v50  ;;  %v492_v36 = vld [vmem:[%s3352_s5 + $0x678] sm:$0xff] }
 0x15e   : > { %2124 = vmatprep.subr.bf16.mxu1 %v2586_v38  ;;  %v2641_v38 = vcombine.low %v480_v55, %v484_v28  ;;  %v2650_v40 = vcombine.high %v488_v35, %v492_v36  ;;  %v376_v49 = vld [vmem:[%s3352_s5 + $0x2d8] sm:$0xff] }
 0x15f   : > { %2084 = vmatpush1.bf16.msra.mxu0 %v2457_v43  ;;  %v496_v43 = vld [vmem:[%s3352_s5 + $0x698] sm:$0xff] }
 0x160   : > { %2085 = vmatprep.subr.bf16.mxu0 %v2466_v45  ;;  %v2521_v45 = vcombine.low %v360_v33, %v364_v34  ;;  %v380_v50 = vld [vmem:[%s3352_s5 + $0x2f8] sm:$0xff] }
 0x161   : > { %2125 = vmatpush1.bf16.msra.mxu1 %v2585_v44  ;;  %v500_v44 = vld [vmem:[%s3352_s5 + $0x6b8] sm:$0xff]  ;;  %v2538_v57 = vcombine.high %v376_v49, %v380_v50 }
 0x162   : > { %2126 = vmatprep.subr.bf16.mxu1 %v2594_v46  ;;  %v2649_v46 = vcombine.low %v488_v35, %v492_v36  ;;  %v2658_v48 = vcombine.high %v496_v43, %v500_v44  ;;  %v384_v61 = vld [vmem:[%s3352_s5 + $0x318] sm:$0xff] }
 0x163   : > { %2086 = vmatpush1.bf16.msra.mxu0 %v2465_v51  ;;  %v504_v51 = vld [vmem:[%s3352_s5 + $0x6d8] sm:$0xff] }
 0x164   : > { %2087 = vmatprep.subr.bf16.mxu0 %v2474_v53  ;;  %v2529_v53 = vcombine.low %v368_v41, %v372_v42  ;;  %v388_v59 = vld [vmem:[%s3352_s5 + $0x338] sm:$0xff] }
 0x165   : > { %2127 = vmatpush1.bf16.msra.mxu1 %v2593_v52  ;;  %v508_v52 = vld [vmem:[%s3352_s5 + $0x6f8] sm:$0xff]  ;;  %v2546_v1 = vcombine.high %v384_v61, %v388_v59 }
 0x166   : > { %2128 = vmatprep.subr.bf16.mxu1 %v2602_v56  ;;  %v2657_v56 = vcombine.low %v496_v43, %v500_v44  ;;  %v2666_v58 = vcombine.high %v504_v51, %v508_v52  ;;  %v396_v4 = vld [vmem:[%s3352_s5 + $0x378] sm:$0xff] }
 0x167   : > { %2088 = vmatpush1.bf16.msra.mxu0 %v2473_v62  ;;  %v512_v62 = vld [vmem:[%s3352_s5 + $0x718] sm:$0xff]  ;;  %v2554_v9 = vcombine.high %v392_v3, %v396_v4 }
 0x168   : > { %2089 = vmatprep.subr.bf16.mxu0 %v2482_v63  ;;  %v2537_v63 = vcombine.low %v376_v49, %v380_v50  ;;  %v400_v11 = vld [vmem:[%s3352_s5 + $0x398] sm:$0xff] }
 0x169   : > { %2129 = vmatpush1.bf16.msra.mxu1 %v2601_v60  ;;  %v516_v60 = vld [vmem:[%s3352_s5 + $0x738] sm:$0xff] }
 0x16a   : > { %2130 = vmatprep.subr.bf16.mxu1 %v2610_v0  ;;  %v2665_v0 = vcombine.low %v504_v51, %v508_v52  ;;  %v2674_v2 = vcombine.high %v512_v62, %v516_v60  ;;  %v404_v12 = vld [vmem:[%s3352_s5 + $0x3b8] sm:$0xff] }
 0x16b   : > { %2090 = vmatpush1.bf16.msra.mxu0 %v2481_v5  ;;  %v520_v5 = vld [vmem:[%s3352_s5 + $0x758] sm:$0xff]  ;;  %v2562_v18 = vcombine.high %v400_v11, %v404_v12 }
 0x16c   : > { %2091 = vmatprep.subr.bf16.mxu0 %v2490_v7  ;;  %v2545_v7 = vcombine.low %v384_v61, %v388_v59  ;;  %v408_v21 = vld [vmem:[%s3352_s5 + $0x3d8] sm:$0xff] }
 0x16d   : > { %2131 = vmatpush1.bf16.msra.mxu1 %v2609_v6  ;;  %v524_v6 = vld [vmem:[%s3352_s5 + $0x778] sm:$0xff] }
 0x16e   : > { %2132 = vmatprep.subr.bf16.mxu1 %v2618_v8  ;;  %v2673_v8 = vcombine.low %v512_v62, %v516_v60  ;;  %v2682_v10 = vcombine.high %v520_v5, %v524_v6  ;;  %v412_v22 = vld [vmem:[%s3352_s5 + $0x3f8] sm:$0xff] }
 0x16f   : > { %2092 = vmatpush1.bf16.msra.mxu0 %v2489_v13  ;;  %v528_v13 = vld [vmem:[%s3352_s5 + $0x798] sm:$0xff]  ;;  %v2570_v26 = vcombine.high %v408_v21, %v412_v22  ;;  %v2569_v55 = vcombine.low %v408_v21, %v412_v22 }
 0x170   : > { %2093 = vmatprep.subr.bf16.mxu0 %v2498_v15  ;;  %v2553_v15 = vcombine.low %v392_v3, %v396_v4  ;;  %v272_v34 = vld [vmem:[#allocation2 + $0x8] sm:$0xff] }
 0x171   : > { %2133 = vmatpush1.bf16.msra.mxu1 %v2617_v14  ;;  %v532_v14 = vld [vmem:[%s3352_s5 + $0x7b8] sm:$0xff] }
 0x172   : > { %2134 = vmatprep.subr.bf16.mxu1 %v2626_v16  ;;  %v2681_v16 = vcombine.low %v520_v5, %v524_v6  ;;  %v2690_v19 = vcombine.high %v528_v13, %v532_v14  ;;  %v276_v60 = vld [vmem:[#allocation2 + $0x28] sm:$0xff] }
 0x173   : > { %2094 = vmatpush1.bf16.msra.mxu0 %v2497_v23  ;;  %v536_v23 = vld [vmem:[%s3352_s5 + $0x7d8] sm:$0xff] }
 0x174   : > { %2095 = vmatprep.subr.bf16.mxu0 %v2506_v25  ;;  %v2561_v25 = vcombine.low %v400_v11, %v404_v12  ;;  %v278_v12 = vld [vmem:[#allocation2 + $0x38] sm:$0xff] }
 0x175   : > { %2135 = vmatpush1.bf16.msra.mxu1 %v2625_v24  ;;  %v540_v24 = vld [vmem:[%s3352_s5 + $0x7f8] sm:$0xff] }
 0x176   : > { %2136 = vmatprep.subr.bf16.mxu1 %v2634_v54  ;;  %v2689_v54 = vcombine.low %v528_v13, %v532_v14  ;;  %v2698_v27 = vcombine.high %v536_v23, %v540_v24  ;;  %v2697_v28 = vcombine.low %v536_v23, %v540_v24  ;;  %v2193_v23 = vlaneseq (!%p2699_p7) }
 0x177   : > { %2096 = vmatpush1.bf16.msra.mxu0 %v2505_v29 }
 0x178   : > { %2097 = vmatprep.subr.bf16.mxu0 %v2514_v31  ;;  %v2194_v24 = vshrl.u32 (!%p2699_p7), %v2193_v23, 7 }
 0x179   : > { %2137 = vmatpush1.bf16.msra.mxu1 %v2633_v30  ;;  %v271_v30 = vld [vmem:[#allocation2] sm:$0xff] }
 0x17a   : > { %2138 = vmatprep.subr.bf16.mxu1 %v2642_v32 }
 0x17b   : > { %2098 = vmatpush1.bf16.msra.mxu0 %v2513_v37 }
 0x17c   : > { %2099 = vmatprep.subr.bf16.mxu0 %v2522_v39 }
 0x17d   : > { %2139 = vmatpush1.bf16.msra.mxu1 %v2641_v38 }
 0x17e   : > { %2140 = vmatprep.subr.bf16.mxu1 %v2650_v40 }
 0x17f   : > { %2100 = vmatpush1.bf16.msra.mxu0 %v2521_v45 }
 0x180   : > { %2101 = vmatprep.subr.bf16.mxu0 %v2530_v47 }
 0x181   : > { %2141 = vmatpush1.bf16.msra.mxu1 %v2649_v46  ;;  %v274_v46 = vld [vmem:[#allocation2 + $0x18] sm:$0xff] }
 0x182   : > { %2142 = vmatprep.subr.bf16.mxu1 %v2658_v48 }
 0x183   : > { %2102 = vmatpush1.bf16.msra.mxu0 %v2529_v53 }
 0x184   : > { %2103 = vmatprep.subr.bf16.mxu0 %v2538_v57 }
 0x185   : > { %2143 = vmatpush1.bf16.msra.mxu1 %v2657_v56 }
 0x186   : > { %2144 = vmatprep.subr.bf16.mxu1 %v2666_v58  ;;  %v275_v58 = vld [vmem:[#allocation2 + $0x20] sm:$0xff] }
 0x187   : > { %2104 = vmatpush1.bf16.msra.mxu0 %v2537_v63 }
 0x188   : > { %2105 = vmatprep.subr.bf16.mxu0 %v2546_v1 }
 0x189   : > { %2145 = vmatpush1.bf16.msra.mxu1 %v2665_v0 }
 0x18a   : > { %2146 = vmatprep.subr.bf16.mxu1 %v2674_v2 }
 0x18b   : > { %2106 = vmatpush1.bf16.msra.mxu0 %v2545_v7 }
 0x18c   : > { %2107 = vmatprep.subr.bf16.mxu0 %v2554_v9 }
 0x18d   : > { %2147 = vmatpush1.bf16.msra.mxu1 %v2673_v8  ;;  %v277_v8 = vld [vmem:[#allocation2 + $0x30] sm:$0xff] }
 0x18e   : > { %2148 = vmatprep.subr.bf16.mxu1 %v2682_v10 }
 0x18f   : > { %2108 = vmatpush1.bf16.msra.mxu0 %v2553_v15 }
 0x190   : > { %2109 = vmatprep.subr.bf16.mxu0 %v2562_v18 }
 0x191   : > { %2149 = vmatpush1.bf16.msra.mxu1 %v2681_v16 }
 0x192   : > { %2150 = vmatprep.subr.bf16.mxu1 %v2690_v19 }
 0x193   : > { %2110 = vmatpush1.bf16.msra.mxu0 %v2561_v25 }
 0x194   : > { %2111 = vmatprep.subr.bf16.mxu0 %v2570_v26 }
 0x195   : > { %2151 = vmatpush1.bf16.msra.mxu1 %v2689_v54  ;;  %v2191_v54 = vld [vmem:[%s3362_s23] sm:$0xff] (!%p2699_p7) }
 0x196   : > { %2152 = vmatprep.subr.bf16.mxu1 %v2698_v27  ;;  %v2195_v27 = vsub.s32 (!%p2699_p7), 0, %v2194_v24 }
 0x197   : > { %2112 = vmatpush1.bf16.msra.mxu0 %v2569_v55  ;;  %v2199_v55 = vsub.s32 (!%p2699_p7), 1, %v2194_v24 }
 0x199   : > { %2153 = vmatpush1.bf16.msra.mxu1 %v2697_v28 }
 0x19a   : > { %2114 = vmatmul.mubr.bf16.vlgmr.msra.gmra.mrb[12].mxu0 %v3462_v17  ;;  %v273_v17 = vld [vmem:[#allocation2 + $0x10] sm:$0xff] }
 0x19c   : > { %2155 = vmatmul.mubr.bf16.vlgmr.msra.gmra.mrb[12].mxu1 %v3468_v20 }
 0x1ad   : > { %v1869_v29 = vpop.f32.mrb[0].mxu0 }
 0x1ae   : > { %v1871_v32 = vpop.f32.mrb[1].mxu0 }
 0x1af   : > { %v1910_v31 = vpop.f32.mrb[0].mxu1  ;;  %v1873_v36 = vpop.f32.mrb[2].mxu0 }
 0x1b0   : > { %v1911_v33 = vadd.f32 %v1910_v31, %v1869_v29  ;;  %v1912_v35 = vpop.f32.mrb[1].mxu1  ;;  %v1874_v39 = vpop.f32.mrb[3].mxu0  ;;  %v2203_v29 = vsub.s32 (!%p2699_p7), 2, %v2194_v24  ;;  %v2223_v36 = vsub.s32 (!%p2699_p7), 7, %v2194_v24 }
 0x1b1   : > { %v1913_v37 = vadd.f32 %v1912_v35, %v1871_v32  ;;  %v1914_v38 = vpop.f32.mrb[2].mxu1  ;;  %v2219_v35 = vsub.s32 (!%p2699_p7), 6, %v2194_v24 }
 0x1b2   : > { %v2163_v40 = vadd.f32 %v1911_v33, %v271_v30  ;;  %v1915_v41 = vpop.f32.mrb[3].mxu1  ;;  %v2207_v30 = vsub.s32 (!%p2699_p7), 3, %v2194_v24  ;;  %v2211_v33 = vsub.s32 (!%p2699_p7), 4, %v2194_v24  ;;  %v2200_v38 = vrot.slane (!%p2699_p7), %v2191_v54, %v2199_v55 }
 0x1b3   : > { %v2164_v42 = vadd.f32 %v1913_v37, %v272_v34  ;;  %v2215_v34 = vsub.s32 (!%p2699_p7), 5, %v2194_v24  ;;  %v2196_v37 = vrot.slane (!%p2699_p7), %v2191_v54, %v2195_v27  ;;  %v2204_v39 = vrot.slane (!%p2699_p7), %v2191_v54, %v2203_v29 }
 0x1b4   : > { %2171 = vst [vmem:[#allocation2] sm:$0xff] %v2163_v40  ;;  %v2208_v40 = vrot.slane (!%p2699_p7), %v2191_v54, %v2207_v30 }
 0x1b5   : > { %2172 = vst [vmem:[#allocation2 + $0x8] sm:$0xff] %v2164_v42 }
 0x1bb   : > { %v2183_v25 = vld [vmem:[#allocation2] sm:$0xff] (!%p2699_p7) }
 0x1bc   : > { %v2184_v26 = vld [vmem:[#allocation2 + $0x8] sm:$0xff] (!%p2699_p7) }
 0x1ed   : > { %v1951_v43 = vpop.f32.mrb[4].mxu0 }
 0x1ee   : > { %v1953_v20 = vpop.f32.mrb[5].mxu0 }
 0x1ef   : > { %v1992_v44 = vpop.f32.mrb[4].mxu1  ;;  %v1955_v48 = vpop.f32.mrb[6].mxu0 }
 0x1f0   : > { %v1993_v45 = vadd.f32 %v1992_v44, %v1951_v43  ;;  %v1994_v47 = vpop.f32.mrb[5].mxu1  ;;  %v1956_v51 = vpop.f32.mrb[7].mxu0  ;;  %v2216_v44 = vrot.slane (!%p2699_p7), %v2191_v54, %v2215_v34 }
 0x1f1   : > { %v1995_v49 = vadd.f32 %v1994_v47, %v1953_v20  ;;  %v1996_v50 = vpop.f32.mrb[6].mxu1  ;;  %v2220_v20 = vrot.slane (!%p2699_p7), %v2191_v54, %v2219_v35  ;;  %v2234_v47 = vadd.f32 (!%p2699_p7), %v2200_v38, %v2184_v26 }
 0x1f2   : > { %v2165_v52 = vadd.f32 %v1993_v45, %v273_v17  ;;  %v1997_v53 = vpop.f32.mrb[7].mxu1  ;;  %v2212_v17 = vrot.slane (!%p2699_p7), %v2191_v54, %v2211_v33  ;;  %v2224_v45 = vrot.slane (!%p2699_p7), %v2191_v54, %v2223_v36 }
 0x1f3   : > { %v2166_v56 = vadd.f32 %v1995_v49, %v274_v46  ;;  %v2233_v46 = vadd.f32 (!%p2699_p7), %v2196_v37, %v2183_v25 }
 0x1f4   : > { %2173 = vst [vmem:[#allocation2 + $0x10] sm:$0xff] %v2165_v52 }
 0x1f5   : > { %2174 = vst [vmem:[#allocation2 + $0x18] sm:$0xff] %v2166_v56  ;;  %v2241_v56 = vmax.f32 (!%p2699_p7), %v2233_v46, 0.0 }
 0x1fb   : > { %v2185_v28 = vld [vmem:[#allocation2 + $0x10] sm:$0xff] (!%p2699_p7) }
 0x1fc   : > { %v2186_v31 = vld [vmem:[#allocation2 + $0x18] sm:$0xff] (!%p2699_p7)  ;;  %v2235_v48 = vadd.f32 (!%p2699_p7), %v2204_v39, %v2185_v28 }
 0x1fd   : > { %v2236_v49 = vadd.f32 (!%p2699_p7), %v2208_v40, %v2186_v31 }
 0x22d   : > { %v2033_v57 = vpop.f32.mrb[8].mxu0 }
 0x22e   : > { %v2035_v59 = vpop.f32.mrb[9].mxu0 }
 0x22f   : > { %v2074_v61 = vpop.f32.mrb[8].mxu1  ;;  %v2037_v0 = vpop.f32.mrb[10].mxu0 }
 0x230   : > { %v2075_v62 = vadd.f32 %v2074_v61, %v2033_v57  ;;  %v2076_v63 = vpop.f32.mrb[9].mxu1  ;;  %v2038_v3 = vpop.f32.mrb[11].mxu0  ;;  %v2242_v57 = vmax.f32 (!%p2699_p7), %v2234_v47, 0.0  ;;  %v2244_v61 = vmax.f32 (!%p2699_p7), %v2236_v49, 0.0 }
 0x231   : > { %v2077_v1 = vadd.f32 %v2076_v63, %v2035_v59  ;;  %v2078_v2 = vpop.f32.mrb[10].mxu1 }
 0x232   : > { %v2167_v4 = vadd.f32 %v2075_v62, %v275_v58  ;;  %v2079_v5 = vpop.f32.mrb[11].mxu1  ;;  %v2243_v58 = vmax.f32 (!%p2699_p7), %v2235_v48, 0.0  ;;  %v2711_v0 = vpack.c.bf16 (!%p2699_p7), %v2242_v57, %v2241_v56 }
 0x233   : > { %v2168_v6 = vadd.f32 %v2077_v1, %v276_v60 }
 0x234   : > { %2175 = vst [vmem:[#allocation2 + $0x20] sm:$0xff] %v2167_v4  ;;  %v2712_v1 = vpack.c.bf16 (!%p2699_p7), %v2244_v61, %v2243_v58  ;;  %2281 = vst [vmem:[%s3369_s4] sm:$0xff] (!%p2699_p7), %v2711_v0 }
 0x235   : > { %2176 = vst [vmem:[#allocation2 + $0x28] sm:$0xff] %v2168_v6 }
 0x236   : > { %2282 = vst [vmem:[%s3369_s4 + $0x8] sm:$0xff] (!%p2699_p7), %v2712_v1 }
 0x23b   : > { %v2187_v32 = vld [vmem:[#allocation2 + $0x20] sm:$0xff] (!%p2699_p7) }
 0x23c   : > { %v2188_v41 = vld [vmem:[#allocation2 + $0x28] sm:$0xff] (!%p2699_p7)  ;;  %v2237_v50 = vadd.f32 (!%p2699_p7), %v2212_v17, %v2187_v32 }
 0x23d   : > { %v2238_v51 = vadd.f32 (!%p2699_p7), %v2216_v44, %v2188_v41 }
 0x23e   : > { %v2245_v59 = vmax.f32 (!%p2699_p7), %v2237_v50, 0.0 }
 0x23f   : > { %v2246_v62 = vmax.f32 (!%p2699_p7), %v2238_v51, 0.0 }
 0x241   : > { %v2713_v2 = vpack.c.bf16 (!%p2699_p7), %v2246_v62, %v2245_v59 }
 0x243   : > { %2283 = vst [vmem:[%s3369_s4 + $0x10] sm:$0xff] (!%p2699_p7), %v2713_v2 }
 0x26d   : > { %v2115_v7 = vpop.f32.mrb[12].mxu0 }
 0x26e   : > { %v2117_v10 = vpop.f32.mrb[13].mxu0 }
 0x26f   : > { %v2156_v9 = vpop.f32.mrb[12].mxu1  ;;  %v2119_v14 = vpop.f32.mrb[14].mxu0  ;;  %2182 = sbr.rel (%p2699_p7) target bundleno = 644 (0x284), region = 52 }
 0x270   : > { %v2157_v11 = vadd.f32 %v2156_v9, %v2115_v7  ;;  %v2158_v13 = vpop.f32.mrb[13].mxu1  ;;  %v2120_v18 = vpop.f32.mrb[15].mxu0 }
 0x271   : > { %v2159_v15 = vadd.f32 %v2158_v13, %v2117_v10  ;;  %v2160_v16 = vpop.f32.mrb[14].mxu1 }
 0x272   : > { %v2169_v19 = vadd.f32 %v2157_v11, %v277_v8  ;;  %v2161_v21 = vpop.f32.mrb[15].mxu1 }
 0x273   : > { %v2170_v22 = vadd.f32 %v2159_v15, %v278_v12 }
 0x274   : > { %2177 = vst [vmem:[#allocation2 + $0x30] sm:$0xff] %v2169_v19 }
 0x275   : > { %2178 = vst [vmem:[#allocation2 + $0x38] sm:$0xff] %v2170_v22 }
 0x27b   : > { %v2189_v42 = vld [vmem:[#allocation2 + $0x30] sm:$0xff] }
 0x27c   : > { %v2190_v43 = vld [vmem:[#allocation2 + $0x38] sm:$0xff]  ;;  %v2239_v52 = vadd.f32 %v2220_v20, %v2189_v42 }
 0x27d   : > { %v2240_v53 = vadd.f32 %v2224_v45, %v2190_v43 }
 0x27e   : > { %v2247_v60 = vmax.f32 %v2239_v52, 0.0 }
 0x27f   : > { %v2248_v63 = vmax.f32 %v2240_v53, 0.0 }
 0x281   : > { %v2714_v3 = vpack.c.bf16 %v2248_v63, %v2247_v60 }
 0x283   : > { %2284 = vst [vmem:[%s3369_s4 + $0x18] sm:$0xff] %v2714_v3 }
 0x284 PF: > { %s2715_s18 = sshll.u32 %s3048_s19, 9  ;;  %s3775_s8 = sld [smem:[#allocation18_spill]] }
 0x285   : > { %s2300_s29 = sshll.u32 %s3369_s4, 4  ;;  %s2286_s6 = scalar_lea.sflag [#allocation5], %s3359_s25  ;;  %s2301_s29 = int_to_ptr.vmem [resolvable:$true] %s2300_s29 }
 0x286   : > { %s2930_s5 = scalar_lea.vmem %s2301_s29, 512  ;;  %s3069_s26 = smov [#allocation9]  }
 0x287   : > { %p2931_p4 = scmp.ne.s32.totalorder %s2301_s29, %s2930_s5  ;;  %s2934_s23 = sshll.u32 %s3069_s26, 4  ;;  %s2935_s23 = int_to_ptr.vmem [resolvable:$false] %s2934_s23 }
 0x288   : > { %s2936_s24 = scalar_lea.vmem %s2935_s23, 1024  ;;  %p2937_p10 = scmp.lt.s32.totalorder %s2301_s29, %s2935_s23 }
 0x289   : > { %p2932_p12 = pnand %p2931_p4, %p3298_p5  ;;  %p2938_p13 = scmp.lt.s32.totalorder %s2936_s24, %s2930_s5 }
 0x28a   : > { %s3678_s30 = scalar_lea.hbm %s3775_s8, %s2715_s18 }
 0x28b   : > { %p2933_p3 = pneg %p2932_p12  ;;  %p2939_p0 = por %p2938_p13, %p2937_p10 }
 0x28d   : > { %p2940_p8 = pnand %p2939_p0, %p2933_p3 }
 0x28f   : > { %2943 = shalt.err (!%p2940_p8)
}
 0x290   : > { %s2944_s19 = scalar_lea.hbm %s3678_s30, 512  ;;  %s2948_s3 = scalar_lea.hbm %s3775_s8, 1024 }
 0x291   : > { %p2945_p11 = scmp.ne.s32.totalorder %s3678_s30, %s2944_s19  ;;  %p2949_p6 = scmp.lt.u32.totalorder %s3678_s30, %s3775_s8 }
 0x292   : > { %p2950_p1 = scmp.lt.u32.totalorder %s2948_s3, %s2944_s19  ;;  %p2952_p4 = scmp.lt.u32.totalorder %s2944_s19, %s3678_s30 }
 0x293   : > { %p2946_p2 = pnand %p2945_p11, %p3298_p5 }
 0x294   : > { %p2951_p7 = por %p2950_p1, %p2949_p6 }
 0x295   : > { %p2947_p9 = pneg %p2946_p2 }
 0x296   : > { %p2953_p12 = por %p2952_p4, %p2951_p7 }
 0x298   : > { %p2954_p3 = pnand %p2953_p12, %p2947_p9 }
 0x29a   : > { %2957 = shalt.err (!%p2954_p3)
}
 0x29b   : > { %2724 = dma.vmem_to_hbm [thread:$0]  (%p3298_p5), %s2301_s29, 512, %s3678_s30, %s2286_s6  }
 0x29c PF: > { %p2744_p10 = scmp.ge.s32.totalorder %s3060_s22, 2  ;;  %s2312_s28 = sand.u32 1, %s3020_s12  }
 0x29d   : > { %p3776_p13 = scmp.ne.s32.totalorder %s3760_s9, 0  ;;  %s2313_s18 = scalar_lea.sflag [#allocation5], %s2312_s28 }
 0x29f   : > { %p2738_p0 = pnand %p2744_p10, %p3776_p13 }
 0x2a1   : > { %3015 = dma.done.wait (!%p2738_p0), %s2313_s18, 512  }
 0x2a2   : > { %3017 = vsyncadd (!%p2738_p0), %s2313_s18, 4294966784  ;;  %s20_s22 = sadd.s32 1, %s3060_s22   ;;  %s3777_s18 = sld [smem:[#allocation14_spill]] }
 0x2a3   : > { %p17_p8 = scmp.ge.s32.totalorder %s20_s22, 8   ;;  %s3778_s20 = sld [smem:[#allocation15_spill]] }
 0x2a4   : > { %s3779_s1 = sld [smem:[#allocation16_spill]]  ;;  %s3780_s12 = smov %s3024_s13 }
 0x2a5   : > { %s3781_s13 = smov %s3028_s14  ;;  %s3782_s14 = smov %s3266_s11 }
 0x2a6   : > { %s3783_s15 = smov %s3036_s16  ;;  %s3784_s16 = smov %s3040_s17 }
 0x2a7   : > { %s3785_s17 = smov %s3175_s10  ;;  %s3786_s19 = smov %s3056_s21 }
 0x2a8   :  { %19 = sbr.rel (!%p17_p8) target bundleno = 13 (0xd), region = 102 }
 0x2aa   : > { %s3787_s21 = smov %s3779_s1 }
 0x2af   :  { %2318 = vsyncpa [#allocation4], 1 }
 0x2b0   :  { %2320 = vsyncpa [#allocation4 + $0x1], 1 }
 0x2b1   :  { %2321 = vsyncpa [#allocation7], 1 }
 0x2b2   :  { %2323 = vsyncpa [#allocation7 + $0x1], 1 }
 0x2b3   :  { %2324 = vsyncpa [#allocation5], 1 }
 0x2b4   :  { %2326 = vsyncpa [#allocation5 + $0x1], 1 }

</bundles_post_ra>
